<compile_context>
chip_gen: v7x
topology: tpu7x:2x2x1
jax: 0.10.0
libtpu: 0.0.40
codegen_flags: <defaults>
</compile_context>

<pallas_src>
import functools
import math

import jax
import jax.numpy as jnp
from jax.experimental import pallas as pl
from jax.experimental.pallas import tpu as pltpu


# ------------------------------------------------------------------ small helpers

def _round_up(x, m):
    return (x + m - 1) // m * m


def _ln_padded(x, g, b, d_real, eps):
    """LayerNorm over a zero-padded feature axis.  Statistics divide by the REAL
    width (padded columns are exactly zero, gamma/beta are zero-padded)."""
    inv_d = 1.0 / d_real
    mean = jnp.sum(x, axis=-1, keepdims=True) * inv_d
    ex2 = jnp.sum(x * x, axis=-1, keepdims=True) * inv_d
    var = ex2 - mean * mean
    return (x - mean) * jax.lax.rsqrt(var + eps) * g + b


# ------------------------------------------------------------------ conv front-end kernel

def _matmul_bias_relu_kernel(x_ref, w_ref, b_ref, o_ref):
    acc = jnp.dot(x_ref[...], w_ref[...], preferred_element_type=jnp.float32)
    acc = acc + b_ref[...]
    o_ref[...] = jnp.maximum(acc, 0.0).astype(o_ref.dtype)


def matmul_bias_relu(x_bf, w_bf, b_f32, tm=256):
    """(M,K)bf16 @ (K,N)bf16 + (1,N)f32 -> relu -> (M,N)bf16.
    Small M: single full block (no padding copy).  Large M: cdiv grid over M,
    Pallas masks the ragged last tile.
    # TODO(synk): add a K-tiled accumulator variant before reusing for large K/N."""
    M, K = x_bf.shape
    N = w_bf.shape[1]
    bm = M if M <= tm else tm
    grid_m = 1 if M <= tm else pl.cdiv(M, tm)
    return pl.pallas_call(
        _matmul_bias_relu_kernel,
        out_shape=jax.ShapeDtypeStruct((M, N), jnp.bfloat16),
        grid=(grid_m,),
        in_specs=[
            pl.BlockSpec((bm, K), lambda i: (i, 0)),
            pl.BlockSpec((K, N), lambda i: (0, 0)),
            pl.BlockSpec((1, N), lambda i: (0, 0)),
        ],
        out_specs=pl.BlockSpec((bm, N), lambda i: (i, 0)),
        compiler_params=pltpu.CompilerParams(
            dimension_semantics=("parallel",)),
    )(x_bf, w_bf, b_f32)


def conv2d_s2_relu(x_nhwc, wm_bf, b_f32):
    """Conv2d(kernel=3, stride=2, pad=0) + ReLU in NHWC via bf16 im2col + Pallas matmul.
    Weights arrive pre-reshaped as (9*Cin, Cout) bf16 (layout fixed on the weight side).
    # TODO(synk): gather the 9 taps in-kernel (pl.ANY src + strided pl.ds copies) to
    # avoid materializing the 9x im2col blob in HBM."""
    x_nhwc = x_nhwc.astype(jnp.bfloat16)
    B, H, W, C = x_nhwc.shape
    Co = wm_bf.shape[1]
    Ho = (H - 3) // 2 + 1
    Wo = (W - 3) // 2 + 1
    patches = [
        x_nhwc[:, ki:ki + 2 * (Ho - 1) + 1:2, kj:kj + 2 * (Wo - 1) + 1:2, :]
        for ki in range(3) for kj in range(3)
    ]
    cols = jnp.concatenate(patches, axis=-1).reshape(B * Ho * Wo, 9 * C)
    y = matmul_bias_relu(cols, wm_bf, b_f32)          # (B*Ho*Wo, Co) bf16
    return y.reshape(B, Ho, Wo, Co)                   # NHWC, no transpose


# ------------------------------------------------------------------ fused encoder stack

def _encoder_stack_kernel(cf_ref, pe_ref, mq_ref, mk_ref, ow_ref, ob_ref,
                          wqkv_ref, bqkv_ref, wo_ref, bo_ref, g1_ref, be1_ref,
                          w1_ref, b1_ref, w2_ref, b2_ref, g2_ref, be2_ref,
                          o_ref, x_vmem,
                          *, heads, dk_pad, d_real, eps):
    """grid = (batch, layer).  The activation lives in x_vmem across the layer axis."""
    l = pl.program_id(1)
    hdk = heads * dk_pad

    # ---- fused embed tail (layer 0 only): Linear (sqrt(d) folded) + PE + mask fill
    @pl.when(l == 0)
    def _():
        y = jnp.dot(cf_ref[...], ow_ref[...], preferred_element_type=jnp.float32)
        y = y + ob_ref[...] + pe_ref[...]
        keep_q = mq_ref[...] > 0.5                    # (Tp, 1)
        x_vmem[...] = jnp.where(keep_q, y, 0.0)

    x = x_vmem[...]                                   # (Tp, Dp) f32
    x_bf = x.astype(jnp.bfloat16)

    # ---- fused QKV projection (one (Dp, 3*H*dk_pad) matmul; 1/sqrt(dk) folded in)
    qkv = jnp.dot(x_bf, wqkv_ref[...], preferred_element_type=jnp.float32) + bqkv_ref[...]

    keep_k = mk_ref[...] > 0.5                        # (1, Tp) key keep-mask
    neg = jnp.finfo(jnp.float32).min

    # ---- per-head attention: every slice is 128-lane aligned, and each head's
    #      context is accumulated directly into the output projection (no concat).
    attn_out = bo_ref[...]                            # (1, Dp) f32, broadcasts
    for h in range(heads):
        qh = qkv[:, h * dk_pad:(h + 1) * dk_pad].astype(jnp.bfloat16)
        kh = qkv[:, hdk + h * dk_pad:hdk + (h + 1) * dk_pad].astype(jnp.bfloat16)
        vh = qkv[:, 2 * hdk + h * dk_pad:2 * hdk + (h + 1) * dk_pad].astype(jnp.bfloat16)
        sc = jax.lax.dot_general(qh, kh, (((1,), (1,)), ((), ())),
                                 preferred_element_type=jnp.float32)   # (Tp, Tp)
        sc = jnp.where(keep_k, sc, neg)               # masked_fill(mask==0, min)
        m = jnp.max(sc, axis=-1, keepdims=True)
        e = jnp.exp(sc - m)
        s = jnp.sum(e, axis=-1, keepdims=True)
        p = e * pl.reciprocal(s, approx=True)         # EUP reciprocal (free slot)
        p = jnp.where(keep_k, p, 0.0)                 # masked_fill(mask==0, 0.0)
        ctx = jnp.dot(p.astype(jnp.bfloat16), vh,
                      preferred_element_type=jnp.float32)              # (Tp, dk_pad)
        attn_out = attn_out + jnp.dot(
            ctx.astype(jnp.bfloat16), wo_ref[h * dk_pad:(h + 1) * dk_pad, :],
            preferred_element_type=jnp.float32)       # += ctx_h @ Wo_h

    # ---- residual + LayerNorm1
    x1 = _ln_padded(x + attn_out, g1_ref[...], be1_ref[...], d_real, eps)

    # ---- FFN (hidden never leaves VMEM) + residual + LayerNorm2
    h1 = jnp.dot(x1.astype(jnp.bfloat16), w1_ref[...],
                 preferred_element_type=jnp.float32) + b1_ref[...]
    h1 = jnp.maximum(h1, 0.0)
    ffn = jnp.dot(h1.astype(jnp.bfloat16), w2_ref[...],
                  preferred_element_type=jnp.float32) + b2_ref[...]
    x2 = _ln_padded(x1 + ffn, g2_ref[...], be2_ref[...], d_real, eps)

    x_vmem[...] = x2                                  # carry to next layer

    @pl.when(l == pl.num_programs(1) - 1)
    def _():
        o_ref[...] = x2.astype(o_ref.dtype)


def encoder_stack(conv_flat_bf, pe_p, maskq_f, maskk_f, packed, *, heads, dk_pad, d_model):
    B, Tp, Fin = conv_flat_bf.shape
    Dp = packed["out_w"].shape[1]
    Hdk = heads * dk_pad
    L = packed["wqkv"].shape[0]
    Up = packed["w1"].shape[2]

    kern = functools.partial(_encoder_stack_kernel, heads=heads, dk_pad=dk_pad,
                             d_real=d_model, eps=1e-5)
    # TODO(synk): at real ESPnet sizes (T~512+, U=2048) add T/U tiling (flash-style
    # K/V loop) and raise vmem_limit_bytes on v5e/v6e; required for v7x's 64 MiB VMEM.
    return pl.pallas_call(
        kern,
        out_shape=jax.ShapeDtypeStruct((B, Tp, Dp), jnp.float32),
        grid=(B, L),
        in_specs=[
            pl.BlockSpec((None, Tp, Fin), lambda b, l: (b, 0, 0)),      # conv features
            pl.BlockSpec((Tp, Dp), lambda b, l: (0, 0)),                # pos encoding
            pl.BlockSpec((None, Tp, 1), lambda b, l: (b, 0, 0)),        # query keep-mask
            pl.BlockSpec((None, 1, Tp), lambda b, l: (b, 0, 0)),        # key keep-mask
            pl.BlockSpec((Fin, Dp), lambda b, l: (0, 0)),               # embed-out W (bf16)
            pl.BlockSpec((1, Dp), lambda b, l: (0, 0)),                 # embed-out b
            pl.BlockSpec((None, Dp, 3 * Hdk), lambda b, l: (l, 0, 0)),  # Wqkv (bf16)
            pl.BlockSpec((None, 1, 3 * Hdk), lambda b, l: (l, 0, 0)),   # bqkv
            pl.BlockSpec((None, Hdk, Dp), lambda b, l: (l, 0, 0)),      # Wo per-head rows
            pl.BlockSpec((None, 1, Dp), lambda b, l: (l, 0, 0)),        # bo
            pl.BlockSpec((None, 1, Dp), lambda b, l: (l, 0, 0)),        # ln1 gamma
            pl.BlockSpec((None, 1, Dp), lambda b, l: (l, 0, 0)),        # ln1 beta
            pl.BlockSpec((None, Dp, Up), lambda b, l: (l, 0, 0)),       # W1 (bf16)
            pl.BlockSpec((None, 1, Up), lambda b, l: (l, 0, 0)),        # b1
            pl.BlockSpec((None, Up, Dp), lambda b, l: (l, 0, 0)),       # W2 (bf16)
            pl.BlockSpec((None, 1, Dp), lambda b, l: (l, 0, 0)),        # b2
            pl.BlockSpec((None, 1, Dp), lambda b, l: (l, 0, 0)),        # ln2 gamma
            pl.BlockSpec((None, 1, Dp), lambda b, l: (l, 0, 0)),        # ln2 beta
        ],
        out_specs=pl.BlockSpec((None, Tp, Dp), lambda b, l: (b, 0, 0)),
        scratch_shapes=[pltpu.VMEM((Tp, Dp), jnp.float32)],
        compiler_params=pltpu.CompilerParams(
            dimension_semantics=("parallel", "arbitrary")),
    )(conv_flat_bf, pe_p, maskq_f, maskk_f,
      packed["out_w"], packed["out_b"],
      packed["wqkv"], packed["bqkv"], packed["wo"], packed["bo"],
      packed["ln1_g"], packed["ln1_b"],
      packed["w1"], packed["b1"], packed["w2"], packed["b2"],
      packed["ln2_g"], packed["ln2_b"])


# ------------------------------------------------------------------ glue

def sinusoidal_pe(length, d_model):
    pos = jnp.arange(length, dtype=jnp.float32)[:, None]
    div = jnp.exp(jnp.arange(0, d_model, 2, dtype=jnp.float32)
                  * (-math.log(10000.0) / d_model))
    pe = jnp.zeros((length, d_model), dtype=jnp.float32)
    pe = pe.at[:, 0::2].set(jnp.sin(pos * div))
    pe = pe.at[:, 1::2].set(jnp.cos(pos * div))
    return pe


def transformer_encoder(inputs, packed, *, d_model, heads):
    """inputs: (B, T, F) f32.  Returns (enc_output (B, T', D), enc_mask (B, 1, T') bool)."""
    B, T, F = inputs.shape
    enc_mask = (jnp.sum(inputs, axis=-1) != 0)[:, None, :]            # (B, 1, T)

    # ---- Conv2dSubsampling: two 3x3 stride-2 convs + ReLU (NHWC, bf16 activations)
    x = inputs[..., None]                                             # (B, T, F, 1)
    x = conv2d_s2_relu(x, packed["conv1_wm"], packed["conv1_b"])      # (B, T1, F1, D)
    x = conv2d_s2_relu(x, packed["conv2_wm"], packed["conv2_b"])      # (B, T2, F2, D)
    _, T2, F2, C = x.shape
    x = x.reshape(B, T2, F2 * C)            # (f, c) flattening; out_w rows pre-permuted

    enc_mask = enc_mask[:, :, :-2:2][:, :, :-2:2]                     # (B, 1, T2)

    Dp = packed["out_w"].shape[1]
    dk_pad = (packed["wqkv"].shape[2] // 3) // heads
    Tp = _round_up(T2, 16)                                            # sublane-dense time

    x = jnp.pad(x, ((0, 0), (0, Tp - T2), (0, 0)))                    # tiny time pad
    mask_p = jnp.pad(enc_mask, ((0, 0), (0, 0), (0, Tp - T2)))        # padded keys = 0
    maskk_f = mask_p.astype(jnp.float32)                              # (B, 1, Tp)
    maskq_f = jnp.transpose(mask_p, (0, 2, 1)).astype(jnp.float32)    # (B, Tp, 1)

    pe = sinusoidal_pe(T2, d_model)
    pe_p = jnp.pad(pe, ((0, Tp - T2), (0, Dp - d_model)))             # (Tp, Dp)

    # ---- single fused pallas_call: embed tail + all encoder layers
    out = encoder_stack(x, pe_p, maskq_f, maskk_f, packed,
                        heads=heads, dk_pad=dk_pad, d_model=d_model)
    return out[:, :T2, :d_model], enc_mask


# ------------------------------------------------------------------ params

def init_params(key, input_size, d_model, heads, linear_units, num_blocks):
    keys = iter(jax.random.split(key, 16 + 16 * num_blocks))

    def nrm(shape, scale=0.05):
        return scale * jax.random.normal(next(keys), shape, dtype=jnp.float32)

    fdim = d_model * (((input_size - 1) // 2 - 1) // 2)
    params = {
        "conv1_w": nrm((d_model, 1, 3, 3), 0.1),
        "conv1_b": nrm((d_model,), 0.1),
        "conv2_w": nrm((d_model, d_model, 3, 3), 0.05),
        "conv2_b": nrm((d_model,), 0.1),
        "out_w": nrm((fdim, d_model), 0.05),
        "out_b": nrm((d_model,), 0.1),
        "blocks": [],
    }
    for _ in range(num_blocks):
        params["blocks"].append(dict(
            wq=nrm((d_model, d_model)), bq=nrm((d_model,)),
            wk=nrm((d_model, d_model)), bk=nrm((d_model,)),
            wv=nrm((d_model, d_model)), bv=nrm((d_model,)),
            wo=nrm((d_model, d_model)), bo=nrm((d_model,)),
            w1=nrm((d_model, linear_units)), b1=nrm((linear_units,)),
            w2=nrm((linear_units, d_model)), b2=nrm((d_model,)),
            ln1_g=jnp.ones((d_model,), jnp.float32), ln1_b=jnp.zeros((d_model,), jnp.float32),
            ln2_g=jnp.ones((d_model,), jnp.float32), ln2_b=jnp.zeros((d_model,), jnp.float32),
        ))
    return params


def pack_params(params, input_size, d_model, heads):
    """One-time weight repacking (outside the forward pass):
       * conv weights -> (9*Cin, Cout) matmul form, bf16
       * embed-out rows permuted (c,f)->(f,c), sqrt(d_model) folded in, cols padded to Dp
       * wq/wk/wv packed into one (Dp, 3*H*dk_pad) matrix with one 128-lane slot per
         head (zero-padded), 1/sqrt(dk) folded into the Q slots
       * wo packed per head into (H*dk_pad, Dp); FFN weights padded to (Dp, Up)/(Up, Dp)
       * LayerNorm gamma/beta and all biases zero-padded to the lane-dense widths
       * all per-layer tensors stacked along a leading layer axis for the fused stack."""
    bf = jnp.bfloat16
    D = d_model
    H = heads
    dk = D // H
    Dp = _round_up(D, 128)
    dkp = _round_up(dk, 128)                  # each head gets its own 128-lane slot
    C = d_model
    f1 = (input_size - 1) // 2
    f2 = (f1 - 1) // 2

    def pad2(w, rows, cols):
        return jnp.pad(w, ((0, rows - w.shape[0]), (0, cols - w.shape[1])))

    def pack_qkv_part(w, b, scale=1.0):
        w3 = (w * scale).reshape(D, H, dk)
        w3 = jnp.pad(w3, ((0, Dp - D), (0, 0), (0, dkp - dk)))
        b3 = jnp.pad((b * scale).reshape(H, dk), ((0, 0), (0, dkp - dk)))
        return w3.reshape(Dp, H * dkp).astype(bf), b3.reshape(1, H * dkp)

    # embed-out: permute rows (c, f) -> (f, c), fold sqrt(d_model), pad cols
    n = jnp.arange(f2 * C)
    src = (n % C) * f2 + n // C
    s_embed = math.sqrt(d_model)
    out_w = pad2(params["out_w"][src] * s_embed, f2 * C, Dp).astype(bf)
    out_b = pad2((params["out_b"] * s_embed).reshape(1, C), 1, Dp)

    packed = {
        "conv1_wm": params["conv1_w"].transpose(2, 3, 1, 0).reshape(9 * 1, C).astype(bf),
        "conv1_b": params["conv1_b"].reshape(1, C),
        "conv2_wm": params["conv2_w"].transpose(2, 3, 1, 0).reshape(9 * C, C).astype(bf),
        "conv2_b": params["conv2_b"].reshape(1, C),
        "out_w": out_w, "out_b": out_b,
    }

    U = params["blocks"][0]["w1"].shape[1]
    Up = _round_up(U, 128)
    att_scale = 1.0 / math.sqrt(dk)

    wqkv, bqkv, wo, bo, g1, be1, w1, b1, w2, b2, g2, be2 = ([] for _ in range(12))
    for blk in params["blocks"]:
        wq_p, bq_p = pack_qkv_part(blk["wq"], blk["bq"], att_scale)
        wk_p, bk_p = pack_qkv_part(blk["wk"], blk["bk"])
        wv_p, bv_p = pack_qkv_part(blk["wv"], blk["bv"])
        wqkv.append(jnp.concatenate([wq_p, wk_p, wv_p], axis=1))
        bqkv.append(jnp.concatenate([bq_p, bk_p, bv_p], axis=1))
        wo3 = jnp.pad(blk["wo"].reshape(H, dk, D),
                      ((0, 0), (0, dkp - dk), (0, Dp - D)))
        wo.append(wo3.reshape(H * dkp, Dp).astype(bf))
        bo.append(pad2(blk["bo"].reshape(1, D), 1, Dp))
        g1.append(pad2(blk["ln1_g"].reshape(1, D), 1, Dp))
        be1.append(pad2(blk["ln1_b"].reshape(1, D), 1, Dp))
        w1.append(pad2(blk["w1"], Dp, Up).astype(bf))
        b1.append(pad2(blk["b1"].reshape(1, U), 1, Up))
        w2.append(pad2(blk["w2"], Up, Dp).astype(bf))
        b2.append(pad2(blk["b2"].reshape(1, D), 1, Dp))
        g2.append(pad2(blk["ln2_g"].reshape(1, D), 1, Dp))
        be2.append(pad2(blk["ln2_b"].reshape(1, D), 1, Dp))

    packed.update(
        wqkv=jnp.stack(wqkv), bqkv=jnp.stack(bqkv),
        wo=jnp.stack(wo), bo=jnp.stack(bo),
        ln1_g=jnp.stack(g1), ln1_b=jnp.stack(be1),
        w1=jnp.stack(w1), b1=jnp.stack(b1),
        w2=jnp.stack(w2), b2=jnp.stack(b2),
        ln2_g=jnp.stack(g2), ln2_b=jnp.stack(be2),
    )
    return packed


# ------------------------------------------------------------------ main

if __name__ == "__main__":
    B, T, FEAT = 2, 32, 16                 # small speech-like input (batch, frames, feat)
    D_MODEL, HEADS, LINEAR_UNITS, NUM_BLOCKS = 32, 4, 64, 2

    key = jax.random.PRNGKey(0)
    k_in, k_par = jax.random.split(key)
    inputs = jax.random.normal(k_in, (B, T, FEAT), dtype=jnp.float32)
    params = init_params(k_par, FEAT, D_MODEL, HEADS, LINEAR_UNITS, NUM_BLOCKS)
    packed = pack_params(params, FEAT, D_MODEL, HEADS)

    fwd = jax.jit(functools.partial(transformer_encoder, d_model=D_MODEL, heads=HEADS))
    enc_out, enc_mask = fwd(inputs, packed)
    jax.block_until_ready(enc_out)
    jax.block_until_ready(enc_mask)

    assert enc_out.shape == (B, 7, D_MODEL) and enc_mask.shape == (B, 1, 7)
    assert bool(jnp.all(jnp.isfinite(enc_out)))
    print("KERNEL_OK")
</pallas_src>

<mosaic_0001>
module attributes {stable_mosaic.version = 11 : i64} {
  func.func @_matmul_bias_relu_kernel(%arg0: i32, %arg1: memref<210x9xbf16, #tpu.memory_space<vmem>>, %arg2: memref<9x32xbf16, #tpu.memory_space<vmem>>, %arg3: memref<1x32xf32, #tpu.memory_space<vmem>>, %arg4: memref<210x32xbf16, #tpu.memory_space<vmem>>) attributes {dimension_semantics = [#tpu.dimension_semantics<parallel>], iteration_bounds = array<i64: 1>, scalar_prefetch = 0 : i64, scratch_operands = 0 : i64, tpu.core_type = #tpu.core_type<tc>, window_params = [{transform_indices = @transform_0, window_bounds = array<i64: 210, 9>}, {pipeline_mode = #tpu.pipeline_mode<synchronous>, transform_indices = @transform_1, window_bounds = array<i64: 9, 32>}, {pipeline_mode = #tpu.pipeline_mode<synchronous>, transform_indices = @transform_2, window_bounds = array<i64: 1, 32>}, {transform_indices = @transform_3, window_bounds = array<i64: 210, 32>}]} {
    %c0 = arith.constant 0 : index
    %c0_0 = arith.constant 0 : index
    %0 = vector.load %arg1[%c0, %c0_0] : memref<210x9xbf16, #tpu.memory_space<vmem>>, vector<210x9xbf16>
    %c0_1 = arith.constant 0 : index
    %c0_2 = arith.constant 0 : index
    %1 = vector.load %arg2[%c0_1, %c0_2] : memref<9x32xbf16, #tpu.memory_space<vmem>>, vector<9x32xbf16>
    %cst = arith.constant dense<0.000000e+00> : vector<210x32xf32>
    %2 = tpu.matmul %0, %1, %cst {dimension_numbers = #tpu.dot_dimension_numbers<[1], [0], [0], [1], [0, 0, 1, 1], [], []>} : vector<210x9xbf16>, vector<9x32xbf16>, vector<210x32xf32> -> vector<210x32xf32>
    %c0_3 = arith.constant 0 : index
    %c0_4 = arith.constant 0 : index
    %3 = vector.load %arg3[%c0_3, %c0_4] : memref<1x32xf32, #tpu.memory_space<vmem>>, vector<1x32xf32>
    %4 = vector.broadcast %3 : vector<1x32xf32> to vector<210x32xf32>
    %5 = arith.addf %2, %4 : vector<210x32xf32>
    %cst_5 = arith.constant 0.000000e+00 : f32
    %6 = vector.broadcast %cst_5 : f32 to vector<210x32xf32>
    %7 = arith.maximumf %5, %6 : vector<210x32xf32>
    %8 = arith.truncf %7 : vector<210x32xf32> to vector<210x32xbf16>
    %c0_6 = arith.constant 0 : index
    %c0_7 = arith.constant 0 : index
    %9 = vector.load %arg4[%c0_6, %c0_7] : memref<210x32xbf16, #tpu.memory_space<vmem>>, vector<210x32xbf16>
    tpu.vector_store %arg4[%c0_6, %c0_7], %8 {strides = array<i32>} : memref<210x32xbf16, #tpu.memory_space<vmem>>, vector<210x32xbf16>,
    return
  }
  func.func @transform_0(%arg0: i32) -> (i32, i32) {
    %c0_i32 = arith.constant 0 : i32
    %c0_i32_0 = arith.constant 0 : i32
    return %arg0, %c0_i32 : i32, i32
  }
  func.func @transform_1(%arg0: i32) -> (i32, i32) {
    %c0_i32 = arith.constant 0 : i32
    %c0_i32_0 = arith.constant 0 : i32
    %c0_i32_1 = arith.constant 0 : i32
    return %c0_i32, %c0_i32_0 : i32, i32
  }
  func.func @transform_2(%arg0: i32) -> (i32, i32) {
    %c0_i32 = arith.constant 0 : i32
    %c0_i32_0 = arith.constant 0 : i32
    %c0_i32_1 = arith.constant 0 : i32
    return %c0_i32, %c0_i32_0 : i32, i32
  }
  func.func @transform_3(%arg0: i32) -> (i32, i32) {
    %c0_i32 = arith.constant 0 : i32
    %c0_i32_0 = arith.constant 0 : i32
    return %arg0, %c0_i32 : i32, i32
  }
}

module attributes {stable_mosaic.version = 11 : i64} {
  func.func @_matmul_bias_relu_kernel(%arg0: i32, %arg1: memref<42x288xbf16, #tpu.memory_space<vmem>>, %arg2: memref<288x32xbf16, #tpu.memory_space<vmem>>, %arg3: memref<1x32xf32, #tpu.memory_space<vmem>>, %arg4: memref<42x32xbf16, #tpu.memory_space<vmem>>) attributes {dimension_semantics = [#tpu.dimension_semantics<parallel>], iteration_bounds = array<i64: 1>, scalar_prefetch = 0 : i64, scratch_operands = 0 : i64, tpu.core_type = #tpu.core_type<tc>, window_params = [{transform_indices = @transform_0, window_bounds = array<i64: 42, 288>}, {pipeline_mode = #tpu.pipeline_mode<synchronous>, transform_indices = @transform_1, window_bounds = array<i64: 288, 32>}, {pipeline_mode = #tpu.pipeline_mode<synchronous>, transform_indices = @transform_2, window_bounds = array<i64: 1, 32>}, {transform_indices = @transform_3, window_bounds = array<i64: 42, 32>}]} {
    %c0 = arith.constant 0 : index
    %c0_0 = arith.constant 0 : index
    %0 = vector.load %arg1[%c0, %c0_0] : memref<42x288xbf16, #tpu.memory_space<vmem>>, vector<42x288xbf16>
    %c0_1 = arith.constant 0 : index
    %c0_2 = arith.constant 0 : index
    %1 = vector.load %arg2[%c0_1, %c0_2] : memref<288x32xbf16, #tpu.memory_space<vmem>>, vector<288x32xbf16>
    %cst = arith.constant dense<0.000000e+00> : vector<42x32xf32>
    %2 = tpu.matmul %0, %1, %cst {dimension_numbers = #tpu.dot_dimension_numbers<[1], [0], [0], [1], [0, 0, 1, 1], [], []>} : vector<42x288xbf16>, vector<288x32xbf16>, vector<42x32xf32> -> vector<42x32xf32>
    %c0_3 = arith.constant 0 : index
    %c0_4 = arith.constant 0 : index
    %3 = vector.load %arg3[%c0_3, %c0_4] : memref<1x32xf32, #tpu.memory_space<vmem>>, vector<1x32xf32>
    %4 = vector.broadcast %3 : vector<1x32xf32> to vector<42x32xf32>
    %5 = arith.addf %2, %4 : vector<42x32xf32>
    %cst_5 = arith.constant 0.000000e+00 : f32
    %6 = vector.broadcast %cst_5 : f32 to vector<42x32xf32>
    %7 = arith.maximumf %5, %6 : vector<42x32xf32>
    %8 = arith.truncf %7 : vector<42x32xf32> to vector<42x32xbf16>
    %c0_6 = arith.constant 0 : index
    %c0_7 = arith.constant 0 : index
    %9 = vector.load %arg4[%c0_6, %c0_7] : memref<42x32xbf16, #tpu.memory_space<vmem>>, vector<42x32xbf16>
    tpu.vector_store %arg4[%c0_6, %c0_7], %8 {strides = array<i32>} : memref<42x32xbf16, #tpu.memory_space<vmem>>, vector<42x32xbf16>,
    return
  }
  func.func @transform_0(%arg0: i32) -> (i32, i32) {
    %c0_i32 = arith.constant 0 : i32
    %c0_i32_0 = arith.constant 0 : i32
    return %arg0, %c0_i32 : i32, i32
  }
  func.func @transform_1(%arg0: i32) -> (i32, i32) {
    %c0_i32 = arith.constant 0 : i32
    %c0_i32_0 = arith.constant 0 : i32
    %c0_i32_1 = arith.constant 0 : i32
    return %c0_i32, %c0_i32_0 : i32, i32
  }
  func.func @transform_2(%arg0: i32) -> (i32, i32) {
    %c0_i32 = arith.constant 0 : i32
    %c0_i32_0 = arith.constant 0 : i32
    %c0_i32_1 = arith.constant 0 : i32
    return %c0_i32, %c0_i32_0 : i32, i32
  }
  func.func @transform_3(%arg0: i32) -> (i32, i32) {
    %c0_i32 = arith.constant 0 : i32
    %c0_i32_0 = arith.constant 0 : i32
    return %arg0, %c0_i32 : i32, i32
  }
}

module attributes {stable_mosaic.version = 11 : i64} {
  func.func @_encoder_stack_kernel(%arg0: i32, %arg1: i32, %arg2: memref<1x16x96xbf16, #tpu.memory_space<vmem>>, %arg3: memref<16x128xf32, #tpu.memory_space<vmem>>, %arg4: memref<1x16x1xf32, #tpu.memory_space<vmem>>, %arg5: memref<1x1x16xf32, #tpu.memory_space<vmem>>, %arg6: memref<96x128xbf16, #tpu.memory_space<vmem>>, %arg7: memref<1x128xf32, #tpu.memory_space<vmem>>, %arg8: memref<1x128x1536xbf16, #tpu.memory_space<vmem>>, %arg9: memref<1x1x1536xf32, #tpu.memory_space<vmem>>, %arg10: memref<1x512x128xbf16, #tpu.memory_space<vmem>>, %arg11: memref<1x1x128xf32, #tpu.memory_space<vmem>>, %arg12: memref<1x1x128xf32, #tpu.memory_space<vmem>>, %arg13: memref<1x1x128xf32, #tpu.memory_space<vmem>>, %arg14: memref<1x128x128xbf16, #tpu.memory_space<vmem>>, %arg15: memref<1x1x128xf32, #tpu.memory_space<vmem>>, %arg16: memref<1x128x128xbf16, #tpu.memory_space<vmem>>, %arg17: memref<1x1x128xf32, #tpu.memory_space<vmem>>, %arg18: memref<1x1x128xf32, #tpu.memory_space<vmem>>, %arg19: memref<1x1x128xf32, #tpu.memory_space<vmem>>, %arg20: memref<1x16x128xf32, #tpu.memory_space<vmem>>, %arg21: memref<16x128xf32, #tpu.memory_space<vmem>>) attributes {dimension_semantics = [#tpu.dimension_semantics<parallel>, #tpu.dimension_semantics<arbitrary>], iteration_bounds = array<i64: 2, 2>, scalar_prefetch = 0 : i64, scratch_operands = 1 : i64, tpu.core_type = #tpu.core_type<tc>, window_params = [{transform_indices = @transform_0, window_bounds = array<i64: 1, 16, 96>}, {pipeline_mode = #tpu.pipeline_mode<synchronous>, transform_indices = @transform_1, window_bounds = array<i64: 16, 128>}, {transform_indices = @transform_2, window_bounds = array<i64: 1, 16, 1>}, {transform_indices = @transform_3, window_bounds = array<i64: 1, 1, 16>}, {pipeline_mode = #tpu.pipeline_mode<synchronous>, transform_indices = @transform_4, window_bounds = array<i64: 96, 128>}, {pipeline_mode = #tpu.pipeline_mode<synchronous>, transform_indices = @transform_5, window_bounds = array<i64: 1, 128>}, {transform_indices = @transform_6, window_bounds = array<i64: 1, 128, 1536>}, {transform_indices = @transform_7, window_bounds = array<i64: 1, 1, 1536>}, {transform_indices = @transform_8, window_bounds = array<i64: 1, 512, 128>}, {transform_indices = @transform_9, window_bounds = array<i64: 1, 1, 128>}, {transform_indices = @transform_10, window_bounds = array<i64: 1, 1, 128>}, {transform_indices = @transform_11, window_bounds = array<i64: 1, 1, 128>}, {transform_indices = @transform_12, window_bounds = array<i64: 1, 128, 128>}, {transform_indices = @transform_13, window_bounds = array<i64: 1, 1, 128>}, {transform_indices = @transform_14, window_bounds = array<i64: 1, 128, 128>}, {transform_indices = @transform_15, window_bounds = array<i64: 1, 1, 128>}, {transform_indices = @transform_16, window_bounds = array<i64: 1, 1, 128>}, {transform_indices = @transform_17, window_bounds = array<i64: 1, 1, 128>}, {transform_indices = @transform_18, window_bounds = array<i64: 1, 16, 128>}]} {
    %c0_i32 = arith.constant 0 : i32
    %0 = arith.cmpi eq, %arg1, %c0_i32 : i32
    %1 = arith.extui %0 : i1 to i32
    %c0_i32_0 = arith.constant 0 : i32
    %2 = arith.cmpi ne, %1, %c0_i32_0 : i32
    scf.if %2 {
      %c0_92 = arith.constant 0 : index
      %c0_93 = arith.constant 0 : index
      %c0_94 = arith.constant 0 : index
      %223 = vector.load %arg2[%c0_92, %c0_93, %c0_94] : memref<1x16x96xbf16, #tpu.memory_space<vmem>>, vector<1x16x96xbf16>
      %224 = vector.shape_cast %223 : vector<1x16x96xbf16> to vector<16x96xbf16>
      %c0_95 = arith.constant 0 : index
      %c0_96 = arith.constant 0 : index
      %225 = vector.load %arg6[%c0_95, %c0_96] : memref<96x128xbf16, #tpu.memory_space<vmem>>, vector<96x128xbf16>
      %cst_97 = arith.constant dense<0.000000e+00> : vector<16x128xf32>
      %226 = tpu.matmul %224, %225, %cst_97 {dimension_numbers = #tpu.dot_dimension_numbers<[1], [0], [0], [1], [0, 0, 1, 1], [], []>} : vector<16x96xbf16>, vector<96x128xbf16>, vector<16x128xf32> -> vector<16x128xf32>
      %c0_98 = arith.constant 0 : index
      %c0_99 = arith.constant 0 : index
      %227 = vector.load %arg7[%c0_98, %c0_99] : memref<1x128xf32, #tpu.memory_space<vmem>>, vector<1x128xf32>
      %228 = vector.broadcast %227 : vector<1x128xf32> to vector<16x128xf32>
      %229 = arith.addf %226, %228 : vector<16x128xf32>
      %c0_100 = arith.constant 0 : index
      %c0_101 = arith.constant 0 : index
      %230 = vector.load %arg3[%c0_100, %c0_101] : memref<16x128xf32, #tpu.memory_space<vmem>>, vector<16x128xf32>
      %231 = arith.addf %229, %230 : vector<16x128xf32>
      %c0_102 = arith.constant 0 : index
      %c0_103 = arith.constant 0 : index
      %c0_104 = arith.constant 0 : index
      %232 = vector.load %arg4[%c0_102, %c0_103, %c0_104] : memref<1x16x1xf32, #tpu.memory_space<vmem>>, vector<1x16x1xf32>
      %233 = vector.shape_cast %232 : vector<1x16x1xf32> to vector<16x1xf32>
      %cst_105 = arith.constant 5.000000e-01 : f32
      %234 = vector.broadcast %cst_105 : f32 to vector<16x1xf32>
      %235 = arith.cmpf ogt, %233, %234 : vector<16x1xf32>
      %cst_106 = arith.constant 0.000000e+00 : f32
      %236 = vector.shape_cast %235 : vector<16x1xi1> to vector<16x1xi1>
      %237 = vector.broadcast %236 : vector<16x1xi1> to vector<16x128xi1>
      %238 = vector.broadcast %cst_106 : f32 to vector<16x128xf32>
      %239 = arith.select %237, %231, %238 : vector<16x128xi1>, vector<16x128xf32>
      %c0_107 = arith.constant 0 : index
      %c0_108 = arith.constant 0 : index
      %240 = vector.load %arg21[%c0_107, %c0_108] : memref<16x128xf32, #tpu.memory_space<vmem>>, vector<16x128xf32>
      tpu.vector_store %arg21[%c0_107, %c0_108], %239 {strides = array<i32>} : memref<16x128xf32, #tpu.memory_space<vmem>>, vector<16x128xf32>,
    } else {
    }
    %c0 = arith.constant 0 : index
    %c0_1 = arith.constant 0 : index
    %3 = vector.load %arg21[%c0, %c0_1] : memref<16x128xf32, #tpu.memory_space<vmem>>, vector<16x128xf32>
    %4 = arith.truncf %3 : vector<16x128xf32> to vector<16x128xbf16>
    %c0_2 = arith.constant 0 : index
    %c0_3 = arith.constant 0 : index
    %c0_4 = arith.constant 0 : index
    %5 = vector.load %arg8[%c0_2, %c0_3, %c0_4] : memref<1x128x1536xbf16, #tpu.memory_space<vmem>>, vector<1x128x1536xbf16>
    %6 = vector.shape_cast %5 : vector<1x128x1536xbf16> to vector<128x1536xbf16>
    %cst = arith.constant dense<0.000000e+00> : vector<16x1536xf32>
    %7 = tpu.matmul %4, %6, %cst {dimension_numbers = #tpu.dot_dimension_numbers<[1], [0], [0], [1], [0, 0, 1, 1], [], []>} : vector<16x128xbf16>, vector<128x1536xbf16>, vector<16x1536xf32> -> vector<16x1536xf32>
    %c0_5 = arith.constant 0 : index
    %c0_6 = arith.constant 0 : index
    %c0_7 = arith.constant 0 : index
    %8 = vector.load %arg9[%c0_5, %c0_6, %c0_7] : memref<1x1x1536xf32, #tpu.memory_space<vmem>>, vector<1x1x1536xf32>
    %9 = vector.shape_cast %8 : vector<1x1x1536xf32> to vector<1x1536xf32>
    %10 = vector.broadcast %9 : vector<1x1536xf32> to vector<16x1536xf32>
    %11 = arith.addf %7, %10 : vector<16x1536xf32>
    %c0_8 = arith.constant 0 : index
    %c0_9 = arith.constant 0 : index
    %c0_10 = arith.constant 0 : index
    %12 = vector.load %arg5[%c0_8, %c0_9, %c0_10] : memref<1x1x16xf32, #tpu.memory_space<vmem>>, vector<1x1x16xf32>
    %13 = vector.shape_cast %12 : vector<1x1x16xf32> to vector<1x16xf32>
    %cst_11 = arith.constant 5.000000e-01 : f32
    %14 = vector.broadcast %cst_11 : f32 to vector<1x16xf32>
    %15 = arith.cmpf ogt, %13, %14 : vector<1x16xf32>
    %c0_12 = arith.constant 0 : index
    %c0_13 = arith.constant 0 : index
    %c0_14 = arith.constant 0 : index
    %16 = vector.load %arg11[%c0_12, %c0_13, %c0_14] : memref<1x1x128xf32, #tpu.memory_space<vmem>>, vector<1x1x128xf32>
    %17 = vector.shape_cast %16 : vector<1x1x128xf32> to vector<1x128xf32>
    %18 = vector.extract_strided_slice %11 {offsets = [0, 0], sizes = [16, 128], strides = [1, 1]} : vector<16x1536xf32> to vector<16x128xf32>
    %19 = arith.truncf %18 : vector<16x128xf32> to vector<16x128xbf16>
    %20 = vector.extract_strided_slice %11 {offsets = [0, 512], sizes = [16, 128], strides = [1, 1]} : vector<16x1536xf32> to vector<16x128xf32>
    %21 = arith.truncf %20 : vector<16x128xf32> to vector<16x128xbf16>
    %22 = vector.extract_strided_slice %11 {offsets = [0, 1024], sizes = [16, 128], strides = [1, 1]} : vector<16x1536xf32> to vector<16x128xf32>
    %23 = arith.truncf %22 : vector<16x128xf32> to vector<16x128xbf16>
    %cst_15 = arith.constant dense<0.000000e+00> : vector<16x16xf32>
    %24 = tpu.matmul %19, %21, %cst_15 {dimension_numbers = #tpu.dot_dimension_numbers<[1], [1], [0], [0], [0, 0, 1, 0], [], []>} : vector<16x128xbf16>, vector<16x128xbf16>, vector<16x16xf32> -> vector<16x16xf32>
    %cst_16 = arith.constant -3.40282347E+38 : f32
    %25 = vector.shape_cast %15 : vector<1x16xi1> to vector<1x16xi1>
    %26 = vector.broadcast %25 : vector<1x16xi1> to vector<16x16xi1>
    %27 = vector.broadcast %cst_16 : f32 to vector<16x16xf32>
    %28 = arith.select %26, %24, %27 : vector<16x16xi1>, vector<16x16xf32>
    %cst_17 = arith.constant dense<0xFF800000> : vector<16xf32>
    %29 = vector.multi_reduction <maximumf>, %28, %cst_17 [1] : vector<16x16xf32> to vector<16xf32>
    %30 = vector.shape_cast %29 : vector<16xf32> to vector<16x1xf32>
    %31 = vector.broadcast %30 : vector<16x1xf32> to vector<16x16xf32>
    %32 = arith.subf %28, %31 : vector<16x16xf32>
    %33 = math.exp %32 : vector<16x16xf32>
    %cst_18 = arith.constant dense<0.000000e+00> : vector<16xf32>
    %34 = vector.multi_reduction <add>, %33, %cst_18 [1] : vector<16x16xf32> to vector<16xf32>
    %35 = vector.shape_cast %34 : vector<16xf32> to vector<16x1xf32>
    %36 = tpu.reciprocal %35 {approx = true} : vector<16x1xf32> -> vector<16x1xf32>
    %37 = vector.broadcast %36 : vector<16x1xf32> to vector<16x16xf32>
    %38 = arith.mulf %33, %37 : vector<16x16xf32>
    %cst_19 = arith.constant 0.000000e+00 : f32
    %39 = vector.shape_cast %15 : vector<1x16xi1> to vector<1x16xi1>
    %40 = vector.broadcast %39 : vector<1x16xi1> to vector<16x16xi1>
    %41 = vector.broadcast %cst_19 : f32 to vector<16x16xf32>
    %42 = arith.select %40, %38, %41 : vector<16x16xi1>, vector<16x16xf32>
    %43 = arith.truncf %42 : vector<16x16xf32> to vector<16x16xbf16>
    %cst_20 = arith.constant dense<0.000000e+00> : vector<16x128xf32>
    %44 = tpu.matmul %43, %23, %cst_20 {dimension_numbers = #tpu.dot_dimension_numbers<[1], [0], [0], [1], [0, 0, 1, 1], [], []>} : vector<16x16xbf16>, vector<16x128xbf16>, vector<16x128xf32> -> vector<16x128xf32>
    %45 = arith.truncf %44 : vector<16x128xf32> to vector<16x128xbf16>
    %c0_21 = arith.constant 0 : index
    %c0_22 = arith.constant 0 : index
    %c0_23 = arith.constant 0 : index
    %46 = vector.load %arg10[%c0_21, %c0_22, %c0_23] : memref<1x512x128xbf16, #tpu.memory_space<vmem>>, vector<1x128x128xbf16>
    %47 = vector.shape_cast %46 : vector<1x128x128xbf16> to vector<128x128xbf16>
    %cst_24 = arith.constant dense<0.000000e+00> : vector<16x128xf32>
    %48 = tpu.matmul %45, %47, %cst_24 {dimension_numbers = #tpu.dot_dimension_numbers<[1], [0], [0], [1], [0, 0, 1, 1], [], []>} : vector<16x128xbf16>, vector<128x128xbf16>, vector<16x128xf32> -> vector<16x128xf32>
    %49 = vector.broadcast %17 : vector<1x128xf32> to vector<16x128xf32>
    %50 = arith.addf %49, %48 : vector<16x128xf32>
    %51 = vector.extract_strided_slice %11 {offsets = [0, 128], sizes = [16, 128], strides = [1, 1]} : vector<16x1536xf32> to vector<16x128xf32>
    %52 = arith.truncf %51 : vector<16x128xf32> to vector<16x128xbf16>
    %53 = vector.extract_strided_slice %11 {offsets = [0, 640], sizes = [16, 128], strides = [1, 1]} : vector<16x1536xf32> to vector<16x128xf32>
    %54 = arith.truncf %53 : vector<16x128xf32> to vector<16x128xbf16>
    %55 = vector.extract_strided_slice %11 {offsets = [0, 1152], sizes = [16, 128], strides = [1, 1]} : vector<16x1536xf32> to vector<16x128xf32>
    %56 = arith.truncf %55 : vector<16x128xf32> to vector<16x128xbf16>
    %cst_25 = arith.constant dense<0.000000e+00> : vector<16x16xf32>
    %57 = tpu.matmul %52, %54, %cst_25 {dimension_numbers = #tpu.dot_dimension_numbers<[1], [1], [0], [0], [0, 0, 1, 0], [], []>} : vector<16x128xbf16>, vector<16x128xbf16>, vector<16x16xf32> -> vector<16x16xf32>
    %cst_26 = arith.constant -3.40282347E+38 : f32
    %58 = vector.shape_cast %15 : vector<1x16xi1> to vector<1x16xi1>
    %59 = vector.broadcast %58 : vector<1x16xi1> to vector<16x16xi1>
    %60 = vector.broadcast %cst_26 : f32 to vector<16x16xf32>
    %61 = arith.select %59, %57, %60 : vector<16x16xi1>, vector<16x16xf32>
    %cst_27 = arith.constant dense<0xFF800000> : vector<16xf32>
    %62 = vector.multi_reduction <maximumf>, %61, %cst_27 [1] : vector<16x16xf32> to vector<16xf32>
    %63 = vector.shape_cast %62 : vector<16xf32> to vector<16x1xf32>
    %64 = vector.broadcast %63 : vector<16x1xf32> to vector<16x16xf32>
    %65 = arith.subf %61, %64 : vector<16x16xf32>
    %66 = math.exp %65 : vector<16x16xf32>
    %cst_28 = arith.constant dense<0.000000e+00> : vector<16xf32>
    %67 = vector.multi_reduction <add>, %66, %cst_28 [1] : vector<16x16xf32> to vector<16xf32>
    %68 = vector.shape_cast %67 : vector<16xf32> to vector<16x1xf32>
    %69 = tpu.reciprocal %68 {approx = true} : vector<16x1xf32> -> vector<16x1xf32>
    %70 = vector.broadcast %69 : vector<16x1xf32> to vector<16x16xf32>
    %71 = arith.mulf %66, %70 : vector<16x16xf32>
    %cst_29 = arith.constant 0.000000e+00 : f32
    %72 = vector.shape_cast %15 : vector<1x16xi1> to vector<1x16xi1>
    %73 = vector.broadcast %72 : vector<1x16xi1> to vector<16x16xi1>
    %74 = vector.broadcast %cst_29 : f32 to vector<16x16xf32>
    %75 = arith.select %73, %71, %74 : vector<16x16xi1>, vector<16x16xf32>
    %76 = arith.truncf %75 : vector<16x16xf32> to vector<16x16xbf16>
    %cst_30 = arith.constant dense<0.000000e+00> : vector<16x128xf32>
    %77 = tpu.matmul %76, %56, %cst_30 {dimension_numbers = #tpu.dot_dimension_numbers<[1], [0], [0], [1], [0, 0, 1, 1], [], []>} : vector<16x16xbf16>, vector<16x128xbf16>, vector<16x128xf32> -> vector<16x128xf32>
    %78 = arith.truncf %77 : vector<16x128xf32> to vector<16x128xbf16>
    %c0_31 = arith.constant 0 : index
    %c128 = arith.constant 128 : index
    %c0_32 = arith.constant 0 : index
    %79 = vector.load %arg10[%c0_31, %c128, %c0_32] : memref<1x512x128xbf16, #tpu.memory_space<vmem>>, vector<1x128x128xbf16>
    %80 = vector.shape_cast %79 : vector<1x128x128xbf16> to vector<128x128xbf16>
    %cst_33 = arith.constant dense<0.000000e+00> : vector<16x128xf32>
    %81 = tpu.matmul %78, %80, %cst_33 {dimension_numbers = #tpu.dot_dimension_numbers<[1], [0], [0], [1], [0, 0, 1, 1], [], []>} : vector<16x128xbf16>, vector<128x128xbf16>, vector<16x128xf32> -> vector<16x128xf32>
    %82 = arith.addf %50, %81 : vector<16x128xf32>
    %83 = vector.extract_strided_slice %11 {offsets = [0, 256], sizes = [16, 128], strides = [1, 1]} : vector<16x1536xf32> to vector<16x128xf32>
    %84 = arith.truncf %83 : vector<16x128xf32> to vector<16x128xbf16>
    %85 = vector.extract_strided_slice %11 {offsets = [0, 768], sizes = [16, 128], strides = [1, 1]} : vector<16x1536xf32> to vector<16x128xf32>
    %86 = arith.truncf %85 : vector<16x128xf32> to vector<16x128xbf16>
    %87 = vector.extract_strided_slice %11 {offsets = [0, 1280], sizes = [16, 128], strides = [1, 1]} : vector<16x1536xf32> to vector<16x128xf32>
    %88 = arith.truncf %87 : vector<16x128xf32> to vector<16x128xbf16>
    %cst_34 = arith.constant dense<0.000000e+00> : vector<16x16xf32>
    %89 = tpu.matmul %84, %86, %cst_34 {dimension_numbers = #tpu.dot_dimension_numbers<[1], [1], [0], [0], [0, 0, 1, 0], [], []>} : vector<16x128xbf16>, vector<16x128xbf16>, vector<16x16xf32> -> vector<16x16xf32>
    %cst_35 = arith.constant -3.40282347E+38 : f32
    %90 = vector.shape_cast %15 : vector<1x16xi1> to vector<1x16xi1>
    %91 = vector.broadcast %90 : vector<1x16xi1> to vector<16x16xi1>
    %92 = vector.broadcast %cst_35 : f32 to vector<16x16xf32>
    %93 = arith.select %91, %89, %92 : vector<16x16xi1>, vector<16x16xf32>
    %cst_36 = arith.constant dense<0xFF800000> : vector<16xf32>
    %94 = vector.multi_reduction <maximumf>, %93, %cst_36 [1] : vector<16x16xf32> to vector<16xf32>
    %95 = vector.shape_cast %94 : vector<16xf32> to vector<16x1xf32>
    %96 = vector.broadcast %95 : vector<16x1xf32> to vector<16x16xf32>
    %97 = arith.subf %93, %96 : vector<16x16xf32>
    %98 = math.exp %97 : vector<16x16xf32>
    %cst_37 = arith.constant dense<0.000000e+00> : vector<16xf32>
    %99 = vector.multi_reduction <add>, %98, %cst_37 [1] : vector<16x16xf32> to vector<16xf32>
    %100 = vector.shape_cast %99 : vector<16xf32> to vector<16x1xf32>
    %101 = tpu.reciprocal %100 {approx = true} : vector<16x1xf32> -> vector<16x1xf32>
    %102 = vector.broadcast %101 : vector<16x1xf32> to vector<16x16xf32>
    %103 = arith.mulf %98, %102 : vector<16x16xf32>
    %cst_38 = arith.constant 0.000000e+00 : f32
    %104 = vector.shape_cast %15 : vector<1x16xi1> to vector<1x16xi1>
    %105 = vector.broadcast %104 : vector<1x16xi1> to vector<16x16xi1>
    %106 = vector.broadcast %cst_38 : f32 to vector<16x16xf32>
    %107 = arith.select %105, %103, %106 : vector<16x16xi1>, vector<16x16xf32>
    %108 = arith.truncf %107 : vector<16x16xf32> to vector<16x16xbf16>
    %cst_39 = arith.constant dense<0.000000e+00> : vector<16x128xf32>
    %109 = tpu.matmul %108, %88, %cst_39 {dimension_numbers = #tpu.dot_dimension_numbers<[1], [0], [0], [1], [0, 0, 1, 1], [], []>} : vector<16x16xbf16>, vector<16x128xbf16>, vector<16x128xf32> -> vector<16x128xf32>
    %110 = arith.truncf %109 : vector<16x128xf32> to vector<16x128xbf16>
    %c0_40 = arith.constant 0 : index
    %c256 = arith.constant 256 : index
    %c0_41 = arith.constant 0 : index
    %111 = vector.load %arg10[%c0_40, %c256, %c0_41] : memref<1x512x128xbf16, #tpu.memory_space<vmem>>, vector<1x128x128xbf16>
    %112 = vector.shape_cast %111 : vector<1x128x128xbf16> to vector<128x128xbf16>
    %cst_42 = arith.constant dense<0.000000e+00> : vector<16x128xf32>
    %113 = tpu.matmul %110, %112, %cst_42 {dimension_numbers = #tpu.dot_dimension_numbers<[1], [0], [0], [1], [0, 0, 1, 1], [], []>} : vector<16x128xbf16>, vector<128x128xbf16>, vector<16x128xf32> -> vector<16x128xf32>
    %114 = arith.addf %82, %113 : vector<16x128xf32>
    %115 = vector.extract_strided_slice %11 {offsets = [0, 384], sizes = [16, 128], strides = [1, 1]} : vector<16x1536xf32> to vector<16x128xf32>
    %116 = arith.truncf %115 : vector<16x128xf32> to vector<16x128xbf16>
    %117 = vector.extract_strided_slice %11 {offsets = [0, 896], sizes = [16, 128], strides = [1, 1]} : vector<16x1536xf32> to vector<16x128xf32>
    %118 = arith.truncf %117 : vector<16x128xf32> to vector<16x128xbf16>
    %119 = vector.extract_strided_slice %11 {offsets = [0, 1408], sizes = [16, 128], strides = [1, 1]} : vector<16x1536xf32> to vector<16x128xf32>
    %120 = arith.truncf %119 : vector<16x128xf32> to vector<16x128xbf16>
    %cst_43 = arith.constant dense<0.000000e+00> : vector<16x16xf32>
    %121 = tpu.matmul %116, %118, %cst_43 {dimension_numbers = #tpu.dot_dimension_numbers<[1], [1], [0], [0], [0, 0, 1, 0], [], []>} : vector<16x128xbf16>, vector<16x128xbf16>, vector<16x16xf32> -> vector<16x16xf32>
    %cst_44 = arith.constant -3.40282347E+38 : f32
    %122 = vector.shape_cast %15 : vector<1x16xi1> to vector<1x16xi1>
    %123 = vector.broadcast %122 : vector<1x16xi1> to vector<16x16xi1>
    %124 = vector.broadcast %cst_44 : f32 to vector<16x16xf32>
    %125 = arith.select %123, %121, %124 : vector<16x16xi1>, vector<16x16xf32>
    %cst_45 = arith.constant dense<0xFF800000> : vector<16xf32>
    %126 = vector.multi_reduction <maximumf>, %125, %cst_45 [1] : vector<16x16xf32> to vector<16xf32>
    %127 = vector.shape_cast %126 : vector<16xf32> to vector<16x1xf32>
    %128 = vector.broadcast %127 : vector<16x1xf32> to vector<16x16xf32>
    %129 = arith.subf %125, %128 : vector<16x16xf32>
    %130 = math.exp %129 : vector<16x16xf32>
    %cst_46 = arith.constant dense<0.000000e+00> : vector<16xf32>
    %131 = vector.multi_reduction <add>, %130, %cst_46 [1] : vector<16x16xf32> to vector<16xf32>
    %132 = vector.shape_cast %131 : vector<16xf32> to vector<16x1xf32>
    %133 = tpu.reciprocal %132 {approx = true} : vector<16x1xf32> -> vector<16x1xf32>
    %134 = vector.broadcast %133 : vector<16x1xf32> to vector<16x16xf32>
    %135 = arith.mulf %130, %134 : vector<16x16xf32>
    %cst_47 = arith.constant 0.000000e+00 : f32
    %136 = vector.shape_cast %15 : vector<1x16xi1> to vector<1x16xi1>
    %137 = vector.broadcast %136 : vector<1x16xi1> to vector<16x16xi1>
    %138 = vector.broadcast %cst_47 : f32 to vector<16x16xf32>
    %139 = arith.select %137, %135, %138 : vector<16x16xi1>, vector<16x16xf32>
    %140 = arith.truncf %139 : vector<16x16xf32> to vector<16x16xbf16>
    %cst_48 = arith.constant dense<0.000000e+00> : vector<16x128xf32>
    %141 = tpu.matmul %140, %120, %cst_48 {dimension_numbers = #tpu.dot_dimension_numbers<[1], [0], [0], [1], [0, 0, 1, 1], [], []>} : vector<16x16xbf16>, vector<16x128xbf16>, vector<16x128xf32> -> vector<16x128xf32>
    %142 = arith.truncf %141 : vector<16x128xf32> to vector<16x128xbf16>
    %c0_49 = arith.constant 0 : index
    %c384 = arith.constant 384 : index
    %c0_50 = arith.constant 0 : index
    %143 = vector.load %arg10[%c0_49, %c384, %c0_50] : memref<1x512x128xbf16, #tpu.memory_space<vmem>>, vector<1x128x128xbf16>
    %144 = vector.shape_cast %143 : vector<1x128x128xbf16> to vector<128x128xbf16>
    %cst_51 = arith.constant dense<0.000000e+00> : vector<16x128xf32>
    %145 = tpu.matmul %142, %144, %cst_51 {dimension_numbers = #tpu.dot_dimension_numbers<[1], [0], [0], [1], [0, 0, 1, 1], [], []>} : vector<16x128xbf16>, vector<128x128xbf16>, vector<16x128xf32> -> vector<16x128xf32>
    %146 = arith.addf %114, %145 : vector<16x128xf32>
    %147 = arith.addf %3, %146 : vector<16x128xf32>
    %c0_52 = arith.constant 0 : index
    %c0_53 = arith.constant 0 : index
    %c0_54 = arith.constant 0 : index
    %148 = vector.load %arg12[%c0_52, %c0_53, %c0_54] : memref<1x1x128xf32, #tpu.memory_space<vmem>>, vector<1x1x128xf32>
    %149 = vector.shape_cast %148 : vector<1x1x128xf32> to vector<1x128xf32>
    %c0_55 = arith.constant 0 : index
    %c0_56 = arith.constant 0 : index
    %c0_57 = arith.constant 0 : index
    %150 = vector.load %arg13[%c0_55, %c0_56, %c0_57] : memref<1x1x128xf32, #tpu.memory_space<vmem>>, vector<1x1x128xf32>
    %151 = vector.shape_cast %150 : vector<1x1x128xf32> to vector<1x128xf32>
    %cst_58 = arith.constant dense<0.000000e+00> : vector<16xf32>
    %152 = vector.multi_reduction <add>, %147, %cst_58 [1] : vector<16x128xf32> to vector<16xf32>
    %153 = vector.shape_cast %152 : vector<16xf32> to vector<16x1xf32>
    %cst_59 = arith.constant 3.125000e-02 : f32
    %154 = vector.broadcast %cst_59 : f32 to vector<16x1xf32>
    %155 = arith.mulf %153, %154 : vector<16x1xf32>
    %156 = arith.mulf %147, %147 : vector<16x128xf32>
    %cst_60 = arith.constant dense<0.000000e+00> : vector<16xf32>
    %157 = vector.multi_reduction <add>, %156, %cst_60 [1] : vector<16x128xf32> to vector<16xf32>
    %158 = vector.shape_cast %157 : vector<16xf32> to vector<16x1xf32>
    %cst_61 = arith.constant 3.125000e-02 : f32
    %159 = vector.broadcast %cst_61 : f32 to vector<16x1xf32>
    %160 = arith.mulf %158, %159 : vector<16x1xf32>
    %161 = arith.mulf %155, %155 : vector<16x1xf32>
    %162 = arith.subf %160, %161 : vector<16x1xf32>
    %163 = vector.broadcast %155 : vector<16x1xf32> to vector<16x128xf32>
    %164 = arith.subf %147, %163 : vector<16x128xf32>
    %cst_62 = arith.constant 9.99999974E-6 : f32
    %165 = vector.broadcast %cst_62 : f32 to vector<16x1xf32>
    %166 = arith.addf %162, %165 : vector<16x1xf32>
    %167 = math.rsqrt %166 : vector<16x1xf32>
    %168 = vector.broadcast %167 : vector<16x1xf32> to vector<16x128xf32>
    %169 = arith.mulf %164, %168 : vector<16x128xf32>
    %170 = vector.broadcast %149 : vector<1x128xf32> to vector<16x128xf32>
    %171 = arith.mulf %169, %170 : vector<16x128xf32>
    %172 = vector.broadcast %151 : vector<1x128xf32> to vector<16x128xf32>
    %173 = arith.addf %171, %172 : vector<16x128xf32>
    %174 = arith.truncf %173 : vector<16x128xf32> to vector<16x128xbf16>
    %c0_63 = arith.constant 0 : index
    %c0_64 = arith.constant 0 : index
    %c0_65 = arith.constant 0 : index
    %175 = vector.load %arg14[%c0_63, %c0_64, %c0_65] : memref<1x128x128xbf16, #tpu.memory_space<vmem>>, vector<1x128x128xbf16>
    %176 = vector.shape_cast %175 : vector<1x128x128xbf16> to vector<128x128xbf16>
    %cst_66 = arith.constant dense<0.000000e+00> : vector<16x128xf32>
    %177 = tpu.matmul %174, %176, %cst_66 {dimension_numbers = #tpu.dot_dimension_numbers<[1], [0], [0], [1], [0, 0, 1, 1], [], []>} : vector<16x128xbf16>, vector<128x128xbf16>, vector<16x128xf32> -> vector<16x128xf32>
    %c0_67 = arith.constant 0 : index
    %c0_68 = arith.constant 0 : index
    %c0_69 = arith.constant 0 : index
    %178 = vector.load %arg15[%c0_67, %c0_68, %c0_69] : memref<1x1x128xf32, #tpu.memory_space<vmem>>, vector<1x1x128xf32>
    %179 = vector.shape_cast %178 : vector<1x1x128xf32> to vector<1x128xf32>
    %180 = vector.broadcast %179 : vector<1x128xf32> to vector<16x128xf32>
    %181 = arith.addf %177, %180 : vector<16x128xf32>
    %cst_70 = arith.constant 0.000000e+00 : f32
    %182 = vector.broadcast %cst_70 : f32 to vector<16x128xf32>
    %183 = arith.maximumf %181, %182 : vector<16x128xf32>
    %184 = arith.truncf %183 : vector<16x128xf32> to vector<16x128xbf16>
    %c0_71 = arith.constant 0 : index
    %c0_72 = arith.constant 0 : index
    %c0_73 = arith.constant 0 : index
    %185 = vector.load %arg16[%c0_71, %c0_72, %c0_73] : memref<1x128x128xbf16, #tpu.memory_space<vmem>>, vector<1x128x128xbf16>
    %186 = vector.shape_cast %185 : vector<1x128x128xbf16> to vector<128x128xbf16>
    %cst_74 = arith.constant dense<0.000000e+00> : vector<16x128xf32>
    %187 = tpu.matmul %184, %186, %cst_74 {dimension_numbers = #tpu.dot_dimension_numbers<[1], [0], [0], [1], [0, 0, 1, 1], [], []>} : vector<16x128xbf16>, vector<128x128xbf16>, vector<16x128xf32> -> vector<16x128xf32>
    %c0_75 = arith.constant 0 : index
    %c0_76 = arith.constant 0 : index
    %c0_77 = arith.constant 0 : index
    %188 = vector.load %arg17[%c0_75, %c0_76, %c0_77] : memref<1x1x128xf32, #tpu.memory_space<vmem>>, vector<1x1x128xf32>
    %189 = vector.shape_cast %188 : vector<1x1x128xf32> to vector<1x128xf32>
    %190 = vector.broadcast %189 : vector<1x128xf32> to vector<16x128xf32>
    %191 = arith.addf %187, %190 : vector<16x128xf32>
    %192 = arith.addf %173, %191 : vector<16x128xf32>
    %c0_78 = arith.constant 0 : index
    %c0_79 = arith.constant 0 : index
    %c0_80 = arith.constant 0 : index
    %193 = vector.load %arg18[%c0_78, %c0_79, %c0_80] : memref<1x1x128xf32, #tpu.memory_space<vmem>>, vector<1x1x128xf32>
    %194 = vector.shape_cast %193 : vector<1x1x128xf32> to vector<1x128xf32>
    %c0_81 = arith.constant 0 : index
    %c0_82 = arith.constant 0 : index
    %c0_83 = arith.constant 0 : index
    %195 = vector.load %arg19[%c0_81, %c0_82, %c0_83] : memref<1x1x128xf32, #tpu.memory_space<vmem>>, vector<1x1x128xf32>
    %196 = vector.shape_cast %195 : vector<1x1x128xf32> to vector<1x128xf32>
    %cst_84 = arith.constant dense<0.000000e+00> : vector<16xf32>
    %197 = vector.multi_reduction <add>, %192, %cst_84 [1] : vector<16x128xf32> to vector<16xf32>
    %198 = vector.shape_cast %197 : vector<16xf32> to vector<16x1xf32>
    %cst_85 = arith.constant 3.125000e-02 : f32
    %199 = vector.broadcast %cst_85 : f32 to vector<16x1xf32>
    %200 = arith.mulf %198, %199 : vector<16x1xf32>
    %201 = arith.mulf %192, %192 : vector<16x128xf32>
    %cst_86 = arith.constant dense<0.000000e+00> : vector<16xf32>
    %202 = vector.multi_reduction <add>, %201, %cst_86 [1] : vector<16x128xf32> to vector<16xf32>
    %203 = vector.shape_cast %202 : vector<16xf32> to vector<16x1xf32>
    %cst_87 = arith.constant 3.125000e-02 : f32
    %204 = vector.broadcast %cst_87 : f32 to vector<16x1xf32>
    %205 = arith.mulf %203, %204 : vector<16x1xf32>
    %206 = arith.mulf %200, %200 : vector<16x1xf32>
    %207 = arith.subf %205, %206 : vector<16x1xf32>
    %208 = vector.broadcast %200 : vector<16x1xf32> to vector<16x128xf32>
    %209 = arith.subf %192, %208 : vector<16x128xf32>
    %cst_88 = arith.constant 9.99999974E-6 : f32
    %210 = vector.broadcast %cst_88 : f32 to vector<16x1xf32>
    %211 = arith.addf %207, %210 : vector<16x1xf32>
    %212 = math.rsqrt %211 : vector<16x1xf32>
    %213 = vector.broadcast %212 : vector<16x1xf32> to vector<16x128xf32>
    %214 = arith.mulf %209, %213 : vector<16x128xf32>
    %215 = vector.broadcast %194 : vector<1x128xf32> to vector<16x128xf32>
    %216 = arith.mulf %214, %215 : vector<16x128xf32>
    %217 = vector.broadcast %196 : vector<1x128xf32> to vector<16x128xf32>
    %218 = arith.addf %216, %217 : vector<16x128xf32>
    %c0_89 = arith.constant 0 : index
    %c0_90 = arith.constant 0 : index
    %219 = vector.load %arg21[%c0_89, %c0_90] : memref<16x128xf32, #tpu.memory_space<vmem>>, vector<16x128xf32>
    tpu.vector_store %arg21[%c0_89, %c0_90], %218 {strides = array<i32>} : memref<16x128xf32, #tpu.memory_space<vmem>>, vector<16x128xf32>,
    %c1_i32 = arith.constant 1 : i32
    %220 = arith.cmpi eq, %arg1, %c1_i32 : i32
    %221 = arith.extui %220 : i1 to i32
    %c0_i32_91 = arith.constant 0 : i32
    %222 = arith.cmpi ne, %221, %c0_i32_91 : i32
    scf.if %222 {
      %c0_92 = arith.constant 0 : index
      %c0_93 = arith.constant 0 : index
      %c0_94 = arith.constant 0 : index
      %223 = vector.load %arg20[%c0_92, %c0_93, %c0_94] : memref<1x16x128xf32, #tpu.memory_space<vmem>>, vector<1x16x128xf32>
      %224 = vector.shape_cast %223 : vector<1x16x128xf32> to vector<16x128xf32>
      %225 = vector.shape_cast %218 : vector<16x128xf32> to vector<1x16x128xf32>
      tpu.vector_store %arg20[%c0_92, %c0_93, %c0_94], %225 {strides = array<i32>} : memref<1x16x128xf32, #tpu.memory_space<vmem>>, vector<1x16x128xf32>,
    } else {
    }
    return
  }
  func.func @transform_0(%arg0: i32, %arg1: i32) -> (i32, i32, i32) {
    %c0_i32 = arith.constant 0 : i32
    %c0_i32_0 = arith.constant 0 : i32
    %c0_i32_1 = arith.constant 0 : i32
    return %arg0, %c0_i32, %c0_i32_0 : i32, i32, i32
  }
  func.func @transform_1(%arg0: i32, %arg1: i32) -> (i32, i32) {
    %c0_i32 = arith.constant 0 : i32
    %c0_i32_0 = arith.constant 0 : i32
    %c0_i32_1 = arith.constant 0 : i32
    return %c0_i32, %c0_i32_0 : i32, i32
  }
  func.func @transform_2(%arg0: i32, %arg1: i32) -> (i32, i32, i32) {
    %c0_i32 = arith.constant 0 : i32
    %c0_i32_0 = arith.constant 0 : i32
    %c0_i32_1 = arith.constant 0 : i32
    return %arg0, %c0_i32, %c0_i32_0 : i32, i32, i32
  }
  func.func @transform_3(%arg0: i32, %arg1: i32) -> (i32, i32, i32) {
    %c0_i32 = arith.constant 0 : i32
    %c0_i32_0 = arith.constant 0 : i32
    %c0_i32_1 = arith.constant 0 : i32
    return %arg0, %c0_i32, %c0_i32_0 : i32, i32, i32
  }
  func.func @transform_4(%arg0: i32, %arg1: i32) -> (i32, i32) {
    %c0_i32 = arith.constant 0 : i32
    %c0_i32_0 = arith.constant 0 : i32
    %c0_i32_1 = arith.constant 0 : i32
    return %c0_i32, %c0_i32_0 : i32, i32
  }
  func.func @transform_5(%arg0: i32, %arg1: i32) -> (i32, i32) {
    %c0_i32 = arith.constant 0 : i32
    %c0_i32_0 = arith.constant 0 : i32
    %c0_i32_1 = arith.constant 0 : i32
    return %c0_i32, %c0_i32_0 : i32, i32
  }
  func.func @transform_6(%arg0: i32, %arg1: i32) -> (i32, i32, i32) {
    %c0_i32 = arith.constant 0 : i32
    %c0_i32_0 = arith.constant 0 : i32
    %c0_i32_1 = arith.constant 0 : i32
    return %arg1, %c0_i32, %c0_i32_0 : i32, i32, i32
  }
  func.func @transform_7(%arg0: i32, %arg1: i32) -> (i32, i32, i32) {
    %c0_i32 = arith.constant 0 : i32
    %c0_i32_0 = arith.constant 0 : i32
    %c0_i32_1 = arith.constant 0 : i32
    return %arg1, %c0_i32, %c0_i32_0 : i32, i32, i32
  }
  func.func @transform_8(%arg0: i32, %arg1: i32) -> (i32, i32, i32) {
    %c0_i32 = arith.constant 0 : i32
    %c0_i32_0 = arith.constant 0 : i32
    %c0_i32_1 = arith.constant 0 : i32
    return %arg1, %c0_i32, %c0_i32_0 : i32, i32, i32
  }
  func.func @transform_9(%arg0: i32, %arg1: i32) -> (i32, i32, i32) {
    %c0_i32 = arith.constant 0 : i32
    %c0_i32_0 = arith.constant 0 : i32
    %c0_i32_1 = arith.constant 0 : i32
    return %arg1, %c0_i32, %c0_i32_0 : i32, i32, i32
  }
  func.func @transform_10(%arg0: i32, %arg1: i32) -> (i32, i32, i32) {
    %c0_i32 = arith.constant 0 : i32
    %c0_i32_0 = arith.constant 0 : i32
    %c0_i32_1 = arith.constant 0 : i32
    return %arg1, %c0_i32, %c0_i32_0 : i32, i32, i32
  }
  func.func @transform_11(%arg0: i32, %arg1: i32) -> (i32, i32, i32) {
    %c0_i32 = arith.constant 0 : i32
    %c0_i32_0 = arith.constant 0 : i32
    %c0_i32_1 = arith.constant 0 : i32
    return %arg1, %c0_i32, %c0_i32_0 : i32, i32, i32
  }
  func.func @transform_12(%arg0: i32, %arg1: i32) -> (i32, i32, i32) {
    %c0_i32 = arith.constant 0 : i32
    %c0_i32_0 = arith.constant 0 : i32
    %c0_i32_1 = arith.constant 0 : i32
    return %arg1, %c0_i32, %c0_i32_0 : i32, i32, i32
  }
  func.func @transform_13(%arg0: i32, %arg1: i32) -> (i32, i32, i32) {
    %c0_i32 = arith.constant 0 : i32
    %c0_i32_0 = arith.constant 0 : i32
    %c0_i32_1 = arith.constant 0 : i32
    return %arg1, %c0_i32, %c0_i32_0 : i32, i32, i32
  }
  func.func @transform_14(%arg0: i32, %arg1: i32) -> (i32, i32, i32) {
    %c0_i32 = arith.constant 0 : i32
    %c0_i32_0 = arith.constant 0 : i32
    %c0_i32_1 = arith.constant 0 : i32
    return %arg1, %c0_i32, %c0_i32_0 : i32, i32, i32
  }
  func.func @transform_15(%arg0: i32, %arg1: i32) -> (i32, i32, i32) {
    %c0_i32 = arith.constant 0 : i32
    %c0_i32_0 = arith.constant 0 : i32
    %c0_i32_1 = arith.constant 0 : i32
    return %arg1, %c0_i32, %c0_i32_0 : i32, i32, i32
  }
  func.func @transform_16(%arg0: i32, %arg1: i32) -> (i32, i32, i32) {
    %c0_i32 = arith.constant 0 : i32
    %c0_i32_0 = arith.constant 0 : i32
    %c0_i32_1 = arith.constant 0 : i32
    return %arg1, %c0_i32, %c0_i32_0 : i32, i32, i32
  }
  func.func @transform_17(%arg0: i32, %arg1: i32) -> (i32, i32, i32) {
    %c0_i32 = arith.constant 0 : i32
    %c0_i32_0 = arith.constant 0 : i32
    %c0_i32_1 = arith.constant 0 : i32
    return %arg1, %c0_i32, %c0_i32_0 : i32, i32, i32
  }
  func.func @transform_18(%arg0: i32, %arg1: i32) -> (i32, i32, i32) {
    %c0_i32 = arith.constant 0 : i32
    %c0_i32_0 = arith.constant 0 : i32
    %c0_i32_1 = arith.constant 0 : i32
    return %arg0, %c0_i32, %c0_i32_0 : i32, i32, i32
  }
}

</mosaic_0001>

<bundles_post_ra>
// kernel: transformer_encoder.3
= control target key start
LH: loop header
LB: loop body
LE: loop exit
PB: predicated region body
PF: predicated region fallthrough
CT: control target
= control target key end

     0   :  { %vm167_vm0 = vcmask 1043456   ;;  %vm168_vm1 = vcmask 1044480   ;;  %vm124_vm2 = vcmask 72704   ;;  %v634_v1 = vmov 65535   ;;  %s853_s1 = inlined_call_operand.vmem [shape: bf16[9,32], index: 1, kind: input, shape index: {}]   ;;  %s854_s0 = inlined_call_operand.vmem [shape: bf16[210,9], index: 0, kind: input, shape index: {}]   ;;  %s855_s2 = inlined_call_operand.vmem [shape: f32[1,32], index: 2, kind: input, shape index: {}]   ;;  %s856_s3 = inlined_call_operand.vmem [shape: bf16[210,32], index: 3, kind: output, shape index: {}]  }
   0x1   :  { %v619_v0 = vld [vmem:[%s853_s1] sm:$0x1f]   ;;  %v169_v2 = vsel %vm167_vm0, 4294967295, %v634_v1  ;;  %v621_v7 = vld [vmem:[%s854_s0 + $0x8] sm:$0xff]   ;;  %v624_v9 = vld [vmem:[%s854_s0 + $0x10] sm:$0xff]   ;;  %vm454_vm3 = vcmask 257024  }
   0x2   :  { %v620_v3 = vld [vmem:[%s854_s0] sm:$0xff]   ;;  %v170_v4 = vsel %vm168_vm1, %v169_v2, 0  ;;  %v623_v8 = vld [vmem:[%s854_s0 + $0x48] sm:$0xff]   ;;  %v626_v10 = vld [vmem:[%s854_s0 + $0x50] sm:$0xff]   ;;  %vm481_vm4 = vcmask 253952  }
   0x3   :  { %v172_v5 = vand.u32 %v619_v0, %v170_v4  ;;  %588 = vmatprep.mubr.msk.bf16.mxu0 %vm124_vm2, %v620_v3  ;;  %v622_v6 = vld [vmem:[%s854_s0 + $0x40] sm:$0xff]   ;;  %v625_v11 = vld [vmem:[%s854_s0 + $0x18] sm:$0xff]   ;;  %v629_v15 = vld [vmem:[%s854_s0 + $0x28] sm:$0xff]  }
   0x4   :  { %604 = vmatprep.mubr.msk.bf16.mxu1 %vm124_vm2, %v622_v6  ;;  %v627_v12 = vld [vmem:[%s854_s0 + $0x58] sm:$0xff]   ;;  %v628_v13 = vld [vmem:[%s854_s0 + $0x20] sm:$0xff]   ;;  %v631_v16 = vld [vmem:[%s854_s0 + $0x68] ss:$0 sps:$4 sm:$0x11]  }
   0x5   :  { %586 = vmatprep.subr.bf16.mxu0 %v172_v5  ;;  %616 = vmatprep.subr.bf16.mxu1 %v172_v5  ;;  %v630_v14 = vld [vmem:[%s854_s0 + $0x60] sm:$0xff]   ;;  %v632_v17 = vld [vmem:[%s854_s0 + $0x30] sm:$0xff]   ;;  %v633_v18 = vld [vmem:[%s854_s0 + $0x38] sm:$0xff]  }
   0x6   :  { %587 = vmatpush3.bf16.msra.mxu0 %v172_v5  ;;  %617 = vmatpush3.bf16.msra.mxu1 %v172_v5  ;;  %v717_v19 = vld [vmem:[%s855_s2] ss:$0 sm:$0xff] }
   0x9   :  { %589 = vmatmul.mubr.msk.bf16.vlgmr.msra.gmra.mrb[0].mxu0 %vm124_vm2, %v621_v7  ;;  %605 = vmatmul.mubr.msk.bf16.vlgmr.msra.gmra.mrb[0].mxu1 %vm124_vm2, %v623_v8 }
   0xa   :  { %592 = vmatprep.mubr.msk.bf16.mxu0 %vm124_vm2, %v624_v9  ;;  %608 = vmatprep.mubr.msk.bf16.mxu1 %vm124_vm2, %v626_v10 }
  0x11   :  { %593 = vmatmul.mubr.msk.bf16.gmra.mrb[4].mxu0 %vm124_vm2, %v625_v11  ;;  %609 = vmatmul.mubr.msk.bf16.gmra.mrb[4].mxu1 %vm124_vm2, %v627_v12 }
  0x12   :  { %596 = vmatprep.mubr.msk.bf16.mxu0 %vm124_vm2, %v628_v13  ;;  %612 = vmatprep.mubr.msk.bf16.mxu1 %vm124_vm2, %v630_v14 }
  0x19   :  { %597 = vmatmul.mubr.msk.bf16.gmra.mrb[8].mxu0 %vm124_vm2, %v629_v15  ;;  %613 = vmatmul.mubr.msk.bf16.gmra.mrb[8].mxu1 %vm124_vm2, %v631_v16 }
  0x1a   :  { %600 = vmatprep.mubr.msk.bf16.mxu0 %vm124_vm2, %v632_v17 }
  0x21   :  { %601 = vmatmul.mubr.msk.bf16.gmra.mrb[12].mxu0 %vm124_vm2, %v633_v18 }
  0xdc   :  { %v590_v20 = vpop.f32.mrb[0].mxu0  ;;  %v606_v21 = vpop.f32.mrb[0].mxu1 }
  0xdd   :  { %v217_v22 = vadd.f32 %v590_v20, %v717_v19  ;;  %v208_v23 = vpop.f32.mrb[1].mxu0  ;;  %v281_v24 = vadd.f32 %v606_v21, %v717_v19  ;;  %v272_v25 = vpop.f32.mrb[1].mxu1 }
  0xde   :  { %v209_v26 = vadd.f32 %v717_v19, %v208_v23  ;;  %v591_v27 = vpop.f32.mrb[2].mxu0  ;;  %v273_v28 = vadd.f32 %v717_v19, %v272_v25  ;;  %v607_v29 = vpop.f32.mrb[2].mxu1 }
  0xdf   :  { %v320_v30 = vmax.f32 %v217_v22, 0.0  ;;  %v220_v31 = vadd.f32 %v591_v27, %v717_v19  ;;  %v211_v32 = vpop.f32.mrb[3].mxu0  ;;  %v336_v33 = vmax.f32 %v281_v24, 0.0  ;;  %v284_v34 = vadd.f32 %v607_v29, %v717_v19  ;;  %v275_v35 = vpop.f32.mrb[3].mxu1 }
  0xe0   :  { %v318_v36 = vmax.f32 %v209_v26, 0.0  ;;  %v212_v37 = vadd.f32 %v717_v19, %v211_v32  ;;  %v334_v38 = vmax.f32 %v273_v28, 0.0  ;;  %v276_v39 = vadd.f32 %v717_v19, %v275_v35 }
  0xe1   :  { %v546_v40 = vpack.c.bf16 %v320_v30, %v320_v30  ;;  %v321_v41 = vmax.f32 %v220_v31, 0.0  ;;  %v562_v42 = vpack.c.bf16 %v336_v33, %v336_v33  ;;  %v337_v43 = vmax.f32 %v284_v34, 0.0 }
  0xe2   :  { %v544_v44 = vpack.c.bf16 %v318_v36, %v318_v36  ;;  %v319_v45 = vmax.f32 %v212_v37, 0.0  ;;  %v560_v46 = vpack.c.bf16 %v334_v38, %v334_v38  ;;  %v335_v47 = vmax.f32 %v276_v39, 0.0 }
  0xe3   :  { %457 = vst.msk [vmem:[%s856_s3 + $0x8] sm:$0xf] %vm454_vm3, %v546_v40  ;;  %v547_v48 = vpack.c.bf16 %v321_v41, %v321_v41  ;;  %473 = vst.msk [vmem:[%s856_s3 + $0x48] sm:$0xf] %vm454_vm3, %v562_v42  ;;  %v563_v49 = vpack.c.bf16 %v337_v43, %v337_v43 }
  0xe4   :  { %455 = vst.msk [vmem:[%s856_s3] sm:$0xf] %vm454_vm3, %v544_v44  ;;  %v545_v50 = vpack.c.bf16 %v319_v45, %v319_v45  ;;  %471 = vst.msk [vmem:[%s856_s3 + $0x40] sm:$0xf] %vm454_vm3, %v560_v46  ;;  %v594_v51 = vpop.f32.mrb[4].mxu0  ;;  %v561_v52 = vpack.c.bf16 %v335_v47, %v335_v47  ;;  %v610_v53 = vpop.f32.mrb[4].mxu1 }
  0xe5   :  { %458 = vst.msk [vmem:[%s856_s3 + $0xc] sm:$0xf] %vm454_vm3, %v547_v48  ;;  %474 = vst.msk [vmem:[%s856_s3 + $0x4c] sm:$0xf] %vm454_vm3, %v563_v49  ;;  %v233_v54 = vadd.f32 %v594_v51, %v717_v19  ;;  %v224_v55 = vpop.f32.mrb[5].mxu0  ;;  %v297_v56 = vadd.f32 %v610_v53, %v717_v19  ;;  %v288_v57 = vpop.f32.mrb[5].mxu1 }
  0xe6   :  { %456 = vst.msk [vmem:[%s856_s3 + $0x4] sm:$0xf] %vm454_vm3, %v545_v50  ;;  %472 = vst.msk [vmem:[%s856_s3 + $0x44] sm:$0xf] %vm454_vm3, %v561_v52  ;;  %v225_v58 = vadd.f32 %v717_v19, %v224_v55  ;;  %v595_v59 = vpop.f32.mrb[6].mxu0  ;;  %v289_v60 = vadd.f32 %v717_v19, %v288_v57  ;;  %v611_v61 = vpop.f32.mrb[6].mxu1 }
  0xe7   :  { %v324_v62 = vmax.f32 %v233_v54, 0.0  ;;  %v236_v63 = vadd.f32 %v595_v59, %v717_v19  ;;  %v227_v0 = vpop.f32.mrb[7].mxu0  ;;  %v340_v1 = vmax.f32 %v297_v56, 0.0  ;;  %v300_v2 = vadd.f32 %v611_v61, %v717_v19  ;;  %v291_v3 = vpop.f32.mrb[7].mxu1 }
  0xe8   :  { %v322_v4 = vmax.f32 %v225_v58, 0.0  ;;  %v228_v5 = vadd.f32 %v717_v19, %v227_v0  ;;  %v338_v6 = vmax.f32 %v289_v60, 0.0  ;;  %v292_v7 = vadd.f32 %v717_v19, %v291_v3 }
  0xe9   :  { %v550_v8 = vpack.c.bf16 %v324_v62, %v324_v62  ;;  %v325_v9 = vmax.f32 %v236_v63, 0.0  ;;  %v566_v10 = vpack.c.bf16 %v340_v1, %v340_v1  ;;  %v341_v11 = vmax.f32 %v300_v2, 0.0 }
  0xea   :  { %v548_v12 = vpack.c.bf16 %v322_v4, %v322_v4  ;;  %v323_v13 = vmax.f32 %v228_v5, 0.0  ;;  %v564_v14 = vpack.c.bf16 %v338_v6, %v338_v6  ;;  %v339_v15 = vmax.f32 %v292_v7, 0.0 }
  0xeb   :  { %461 = vst.msk [vmem:[%s856_s3 + $0x18] sm:$0xf] %vm454_vm3, %v550_v8  ;;  %v551_v16 = vpack.c.bf16 %v325_v9, %v325_v9  ;;  %477 = vst.msk [vmem:[%s856_s3 + $0x58] sm:$0xf] %vm454_vm3, %v566_v10  ;;  %v567_v17 = vpack.c.bf16 %v341_v11, %v341_v11 }
  0xec   :  { %459 = vst.msk [vmem:[%s856_s3 + $0x10] sm:$0xf] %vm454_vm3, %v548_v12  ;;  %v549_v18 = vpack.c.bf16 %v323_v13, %v323_v13  ;;  %475 = vst.msk [vmem:[%s856_s3 + $0x50] sm:$0xf] %vm454_vm3, %v564_v14  ;;  %v598_v20 = vpop.f32.mrb[8].mxu0  ;;  %v565_v21 = vpack.c.bf16 %v339_v15, %v339_v15  ;;  %v614_v22 = vpop.f32.mrb[8].mxu1 }
  0xed   :  { %462 = vst.msk [vmem:[%s856_s3 + $0x1c] sm:$0xf] %vm454_vm3, %v551_v16  ;;  %478 = vst.msk [vmem:[%s856_s3 + $0x5c] sm:$0xf] %vm454_vm3, %v567_v17  ;;  %v249_v23 = vadd.f32 %v598_v20, %v717_v19  ;;  %v240_v24 = vpop.f32.mrb[9].mxu0  ;;  %v313_v25 = vadd.f32 %v614_v22, %v717_v19  ;;  %v304_v26 = vpop.f32.mrb[9].mxu1 }
  0xee   :  { %460 = vst.msk [vmem:[%s856_s3 + $0x14] sm:$0xf] %vm454_vm3, %v549_v18  ;;  %476 = vst.msk [vmem:[%s856_s3 + $0x54] sm:$0xf] %vm454_vm3, %v565_v21  ;;  %v241_v27 = vadd.f32 %v717_v19, %v240_v24  ;;  %v599_v28 = vpop.f32.mrb[10].mxu0  ;;  %v305_v29 = vadd.f32 %v717_v19, %v304_v26  ;;  %v615_v30 = vpop.f32.mrb[10].mxu1 }
  0xef   :  { %v328_v31 = vmax.f32 %v249_v23, 0.0  ;;  %v252_v32 = vadd.f32 %v599_v28, %v717_v19  ;;  %v243_v33 = vpop.f32.mrb[11].mxu0  ;;  %v344_v34 = vmax.f32 %v313_v25, 0.0  ;;  %v307_v35 = vpop.f32.mrb[11].mxu1 }
  0xf0   :  { %v326_v36 = vmax.f32 %v241_v27, 0.0  ;;  %v244_v37 = vadd.f32 %v717_v19, %v243_v33  ;;  %v342_v38 = vmax.f32 %v305_v29, 0.0  ;;  %v308_v39 = vadd.f32 %v717_v19, %v307_v35 }
  0xf1   :  { %v554_v40 = vpack.c.bf16 %v328_v31, %v328_v31  ;;  %v329_v41 = vmax.f32 %v252_v32, 0.0  ;;  %v570_v42 = vpack.c.bf16 %v344_v34, %v344_v34 }
  0xf2   :  { %v552_v43 = vpack.c.bf16 %v326_v36, %v326_v36  ;;  %v327_v44 = vmax.f32 %v244_v37, 0.0  ;;  %v568_v45 = vpack.c.bf16 %v342_v38, %v342_v38  ;;  %v343_v46 = vmax.f32 %v308_v39, 0.0 }
  0xf3   :  { %465 = vst.msk [vmem:[%s856_s3 + $0x28] sm:$0xf] %vm454_vm3, %v554_v40  ;;  %v555_v47 = vpack.c.bf16 %v329_v41, %v329_v41 }
  0xf4   :  { %482 = vst.msk [vmem:[%s856_s3 + $0x68] sm:$0x1] %vm481_vm4, %v570_v42  ;;  %v553_v48 = vpack.c.bf16 %v327_v44, %v327_v44  ;;  %v602_v49 = vpop.f32.mrb[12].mxu0  ;;  %v569_v50 = vpack.c.bf16 %v343_v46, %v343_v46 }
  0xf5   :  { %463 = vst.msk [vmem:[%s856_s3 + $0x20] sm:$0xf] %vm454_vm3, %v552_v43  ;;  %479 = vst.msk [vmem:[%s856_s3 + $0x60] sm:$0xf] %vm454_vm3, %v568_v45  ;;  %v265_v51 = vadd.f32 %v602_v49, %v717_v19  ;;  %v256_v52 = vpop.f32.mrb[13].mxu0 }
  0xf6   :  { %466 = vst.msk [vmem:[%s856_s3 + $0x2c] sm:$0xf] %vm454_vm3, %v555_v47  ;;  %464 = vst.msk [vmem:[%s856_s3 + $0x24] sm:$0xf] %vm454_vm3, %v553_v48  ;;  %v257_v53 = vadd.f32 %v717_v19, %v256_v52  ;;  %v603_v54 = vpop.f32.mrb[14].mxu0 }
  0xf7   :  { %480 = vst.msk [vmem:[%s856_s3 + $0x64] sm:$0xf] %vm454_vm3, %v569_v50  ;;  %v332_v55 = vmax.f32 %v265_v51, 0.0  ;;  %v268_v56 = vadd.f32 %v603_v54, %v717_v19  ;;  %v259_v57 = vpop.f32.mrb[15].mxu0 }
  0xf8   :  { %v330_v58 = vmax.f32 %v257_v53, 0.0  ;;  %v260_v59 = vadd.f32 %v717_v19, %v259_v57 }
  0xf9   :  { %v558_v60 = vpack.c.bf16 %v332_v55, %v332_v55  ;;  %v333_v61 = vmax.f32 %v268_v56, 0.0 }
  0xfa   :  { %v556_v62 = vpack.c.bf16 %v330_v58, %v330_v58  ;;  %v331_v63 = vmax.f32 %v260_v59, 0.0 }
  0xfb   :  { %469 = vst.msk [vmem:[%s856_s3 + $0x38] sm:$0xf] %vm454_vm3, %v558_v60  ;;  %v559_v0 = vpack.c.bf16 %v333_v61, %v333_v61 }
  0xfc   :  { %467 = vst.msk [vmem:[%s856_s3 + $0x30] sm:$0xf] %vm454_vm3, %v556_v62  ;;  %v557_v1 = vpack.c.bf16 %v331_v63, %v331_v63 }
  0xfd   :  { %470 = vst.msk [vmem:[%s856_s3 + $0x3c] sm:$0xf] %vm454_vm3, %v559_v0 }
  0xfe   :  { %468 = vst.msk [vmem:[%s856_s3 + $0x34] sm:$0xf] %vm454_vm3, %v557_v1 }

// kernel: transformer_encoder.4
= control target key start
LH: loop header
LB: loop body
LE: loop exit
PB: predicated region body
PF: predicated region fallthrough
CT: control target
= control target key end

     0   :  { %v519_v1 = vmov 0.0   ;;  %vm520_vm0 = vmmov 0   ;;  %vm223_vm1 = vcmask 261120   ;;  %vm377_vm2 = vcmask 257024   ;;  %s654_s1 = inlined_call_operand.vmem [shape: bf16[288,32], index: 1, kind: input, shape index: {}]   ;;  %s655_s0 = inlined_call_operand.vmem [shape: bf16[42,288], index: 0, kind: input, shape index: {}]   ;;  %s656_s2 = inlined_call_operand.vmem [shape: f32[1,32], index: 2, kind: input, shape index: {}]   ;;  %s657_s3 = inlined_call_operand.vmem [shape: bf16[42,32], index: 3, kind: output, shape index: {}]  }
   0x1   :  { %v489_v0 = vld [vmem:[%s654_s1 + $0x40] sm:$0xff]   ;;  %471 = vmatprep.subr.bf16.mxu1 %v519_v1  ;;  %475 = vmatprep.mubr.msk.bf16.mxu1 %vm520_vm0, %v519_v1  ;;  %v491_v3 = vld [vmem:[%s654_s1 + $0x48] sm:$0xff]   ;;  %v493_v5 = vld [vmem:[%s654_s1 + $0x50] sm:$0xff]   ;;  %vm383_vm3 = vcmask 253952  }
   0x2   :  { %v490_v2 = vld [vmem:[%s654_s1] sm:$0xff]   ;;  %432 = vmatprep.subr.bf16.mxu0 %v489_v0  ;;  %v492_v4 = vld [vmem:[%s654_s1 + $0x8] sm:$0xff]   ;;  %v494_v6 = vld [vmem:[%s654_s1 + $0x10] sm:$0xff]  }
   0x3   :  { %433 = vmatpush3.bf16.msra.mxu0 %v490_v2  ;;  %v495_v7 = vld [vmem:[%s654_s1 + $0x58] sm:$0xff]   ;;  %v497_v9 = vld [vmem:[%s654_s1 + $0x60] sm:$0xff]   ;;  %v499_v12 = vld [vmem:[%s654_s1 + $0x68] sm:$0xff]  }
   0x4   :  { %434 = vmatprep.subr.bf16.mxu0 %v491_v3  ;;  %v496_v8 = vld [vmem:[%s654_s1 + $0x18] sm:$0xff]   ;;  %v503_v10 = vld [vmem:[%s654_s1 + $0x80] sm:$0xff]   ;;  %v500_v13 = vld [vmem:[%s654_s1 + $0x28] sm:$0xff]  }
   0x5   :  { %v498_v11 = vld [vmem:[%s654_s1 + $0x20] sm:$0xff]   ;;  %472 = vmatpush3.bf16.msra.mxu1 %v503_v10  ;;  %v501_v14 = vld [vmem:[%s654_s1 + $0x70] sm:$0xff]   ;;  %v509_v16 = vld [vmem:[%s654_s1 + $0x88] sm:$0xff]  }
   0x6   :  { %473 = vmatprep.subr.bf16.mxu1 %v519_v1  ;;  %v508_v15 = vld [vmem:[%s655_s0 + $0x4] ss:$12 sps:$4 sm:$0xff]   ;;  %v510_v17 = vld [vmem:[%s655_s0 + $0x8] ss:$12 sps:$4 sm:$0xff]   ;;  %v504_v19 = vld [vmem:[%s654_s1 + $0x78] sm:$0xff]  }
   0x7   :  { %435 = vmatpush3.bf16.msra.mxu0 %v492_v4  ;;  %265 = vmatprep.mubr.bf16.mxu0 %v508_v15  ;;  %v502_v18 = vld [vmem:[%s654_s1 + $0x30] sm:$0xff]   ;;  %v505_v20 = vld [vmem:[%s654_s1 + $0x38] sm:$0xff]   ;;  %v514_v21 = vld [vmem:[%s655_s0 + $0x20] ss:$12 sps:$4 sm:$0xff]  }
   0x8   :  { %436 = vmatprep.subr.bf16.mxu0 %v493_v5  ;;  %v506_v22 = vld [vmem:[%s655_s0] ss:$12 sps:$4 sm:$0xff]   ;;  %v511_v23 = vld [vmem:[%s655_s0 + $0x1c] ss:$12 sps:$4 sm:$0xff]   ;;  %v513_v25 = vld [vmem:[%s655_s0 + $0x18] ss:$12 sps:$4 sm:$0xff]  }
   0x9   :  { %474 = vmatpush3.bf16.msra.mxu1 %v509_v16  ;;  %v518_v24 = vld [vmem:[%s655_s0 + $0x38] ss:$12 sps:$4 sm:$0x1f]   ;;  %v515_v26 = vld [vmem:[%s655_s0 + $0x34] ss:$12 sps:$4 sm:$0x1f]  }
   0xa   :  { %v517_v27 = vld [vmem:[%s655_s0 + $0x30] ss:$12 sps:$4 sm:$0x1f]   ;;  %v389_v37 = vld [vmem:[%s656_s2] ss:$0 sm:$0xff] }
   0xb   :  { %437 = vmatpush3.bf16.msra.mxu0 %v494_v6 }
   0xc   :  { %438 = vmatprep.subr.bf16.mxu0 %v495_v7  ;;  %476 = vmatmul.mubr.msk.bf16.vlgmr.msra.gmra.mrb[0].mxu1 %vm223_vm1, %v510_v17 }
   0xd   :  { %479 = vmatprep.mubr.msk.bf16.mxu1 %vm520_vm0, %v519_v1 }
   0xf   :  { %439 = vmatpush3.bf16.msra.mxu0 %v496_v8 }
  0x10   :  { %440 = vmatprep.subr.bf16.mxu0 %v497_v9 }
  0x13   :  { %441 = vmatpush3.bf16.msra.mxu0 %v498_v11 }
  0x14   :  { %442 = vmatprep.subr.bf16.mxu0 %v499_v12  ;;  %480 = vmatmul.mubr.msk.bf16.gmra.mrb[4].mxu1 %vm223_vm1, %v514_v21 }
  0x15   :  { %483 = vmatprep.mubr.msk.bf16.mxu1 %vm520_vm0, %v519_v1 }
  0x17   :  { %443 = vmatpush3.bf16.msra.mxu0 %v500_v13 }
  0x18   :  { %444 = vmatprep.subr.bf16.mxu0 %v501_v14 }
  0x1b   :  { %445 = vmatpush3.bf16.msra.mxu0 %v502_v18 }
  0x1c   :  { %446 = vmatprep.subr.bf16.mxu0 %v504_v19  ;;  %484 = vmatmul.mubr.msk.bf16.gmra.mrb[8].mxu1 %vm223_vm1, %v518_v24 }
  0x1f   :  { %447 = vmatpush3.bf16.msra.mxu0 %v505_v20 }
  0x22   :  { %266 = vmatmul.mubr.bf16.vlgmr.msra.gmra.mrb[0].mxu0 %v506_v22 }
  0x23   :  { %273 = vmatprep.mubr.bf16.mxu0 %v511_v23 }
  0x2a   :  { %274 = vmatmul.mubr.bf16.gmra.mrb[4].mxu0 %v513_v25 }
  0x2b   :  { %281 = vmatprep.mubr.bf16.mxu0 %v515_v26 }
  0x32   :  { %282 = vmatmul.mubr.bf16.gmra.mrb[8].mxu0 %v517_v27 }
  0xdf   :  { %v324_v28 = vpop.f32.mrb[0].mxu1 }
  0xe0   :  { %v477_v29 = vpop.f32.mrb[1].mxu1 }
  0xe1   :  { %v327_v30 = vpop.f32.mrb[2].mxu1 }
  0xe2   :  { %v478_v31 = vpop.f32.mrb[3].mxu1 }
  0xe7   :  { %v332_v32 = vpop.f32.mrb[4].mxu1 }
  0xe8   :  { %v481_v33 = vpop.f32.mrb[5].mxu1 }
  0xe9   :  { %v335_v35 = vpop.f32.mrb[6].mxu1 }
  0xea   :  { %v482_v38 = vpop.f32.mrb[7].mxu1 }
  0xef   :  { %v340_v46 = vpop.f32.mrb[8].mxu1 }
  0xf0   :  { %v485_v47 = vpop.f32.mrb[9].mxu1 }
  0xf1   :  { %v343_v51 = vpop.f32.mrb[10].mxu1 }
  0xf2   :  { %v486_v53 = vpop.f32.mrb[11].mxu1 }
  0xf5   :  { %v448_v34 = vpop.f32.mrb[0].mxu0 }
  0xf6   :  { %v449_v36 = vpop.f32.mrb[1].mxu0 }
  0xf7   :  { %v450_v39 = vadd.f32 %v449_v36, %v448_v34  ;;  %v451_v40 = vpop.f32.mrb[2].mxu0 }
  0xf8   :  { %v452_v41 = vpop.f32.mrb[3].mxu0 }
  0xf9   :  { %v268_v42 = vadd.f32 %v450_v39, %v389_v37  ;;  %v453_v43 = vadd.f32 %v452_v41, %v451_v40 }
  0xfb   :  { %v325_v44 = vadd.f32 %v324_v28, %v268_v42  ;;  %v271_v45 = vadd.f32 %v453_v43, %v389_v37 }
  0xfd   :  { %v347_v48 = vmax.f32 %v325_v44, 0.0  ;;  %v328_v49 = vadd.f32 %v327_v30, %v271_v45  ;;  %v454_v50 = vpop.f32.mrb[4].mxu0 }
  0xfe   :  { %v455_v52 = vpop.f32.mrb[5].mxu0 }
  0xff   :  { %v426_v54 = vpack.c.bf16 %v347_v48, %v347_v48  ;;  %v348_v55 = vmax.f32 %v328_v49, 0.0  ;;  %v456_v56 = vadd.f32 %v455_v52, %v454_v50  ;;  %v457_v57 = vpop.f32.mrb[6].mxu0 }
 0x100   :  { %v458_v58 = vpop.f32.mrb[7].mxu0 }
 0x101   :  { %378 = vst.msk [vmem:[%s657_s3] sm:$0xf] %vm377_vm2, %v426_v54  ;;  %v427_v59 = vpack.c.bf16 %v348_v55, %v348_v55  ;;  %v276_v60 = vadd.f32 %v456_v56, %v389_v37  ;;  %v459_v61 = vadd.f32 %v458_v58, %v457_v57 }
 0x103   :  { %379 = vst.msk [vmem:[%s657_s3 + $0x4] sm:$0xf] %vm377_vm2, %v427_v59  ;;  %v333_v62 = vadd.f32 %v332_v32, %v276_v60  ;;  %v279_v63 = vadd.f32 %v459_v61, %v389_v37 }
 0x105   :  { %v349_v0 = vmax.f32 %v333_v62, 0.0  ;;  %v336_v1 = vadd.f32 %v335_v35, %v279_v63  ;;  %v460_v2 = vpop.f32.mrb[8].mxu0 }
 0x106   :  { %v461_v3 = vpop.f32.mrb[9].mxu0 }
 0x107   :  { %v428_v4 = vpack.c.bf16 %v349_v0, %v349_v0  ;;  %v350_v5 = vmax.f32 %v336_v1, 0.0  ;;  %v462_v6 = vadd.f32 %v461_v3, %v460_v2  ;;  %v463_v7 = vpop.f32.mrb[10].mxu0 }
 0x108   :  { %v464_v8 = vpop.f32.mrb[11].mxu0 }
 0x109   :  { %380 = vst.msk [vmem:[%s657_s3 + $0x8] sm:$0xf] %vm377_vm2, %v428_v4  ;;  %v429_v9 = vpack.c.bf16 %v350_v5, %v350_v5  ;;  %v284_v10 = vadd.f32 %v462_v6, %v389_v37  ;;  %v465_v11 = vadd.f32 %v464_v8, %v463_v7 }
 0x10b   :  { %381 = vst.msk [vmem:[%s657_s3 + $0xc] sm:$0xf] %vm377_vm2, %v429_v9  ;;  %v341_v12 = vadd.f32 %v340_v46, %v284_v10  ;;  %v287_v13 = vadd.f32 %v465_v11, %v389_v37 }
 0x10d   :  { %v351_v14 = vmax.f32 %v341_v12, 0.0  ;;  %v344_v15 = vadd.f32 %v343_v51, %v287_v13 }
 0x10f   :  { %v430_v16 = vpack.c.bf16 %v351_v14, %v351_v14  ;;  %v352_v17 = vmax.f32 %v344_v15, 0.0 }
 0x111   :  { %382 = vst.msk [vmem:[%s657_s3 + $0x10] sm:$0xf] %vm377_vm2, %v430_v16  ;;  %v431_v18 = vpack.c.bf16 %v352_v17, %v352_v17 }
 0x113   :  { %384 = vst.msk [vmem:[%s657_s3 + $0x14] sm:$0x1] %vm383_vm3, %v431_v18 }

// kernel: transformer_encoder.5
= control target key start
LH: loop header
LB: loop body
LE: loop exit
PB: predicated region body
PF: predicated region fallthrough
CT: control target
= control target key end

     0   :  { %s4182_s27 = smov 0   ;;  %s4184_s28 = smov 0   ;;  %s4779_s0 = inlined_call_operand.vmem [shape: bf16[2,16,96], index: 0, kind: input, shape index: {}]   ;;  %s4780_s1 = inlined_call_operand.vmem [shape: f32[16,128], index: 1, kind: input, shape index: {}]   ;;  %s4781_s2 = inlined_call_operand.vmem [shape: f32[2,16,1], index: 2, kind: input, shape index: {}]   ;;  %s4782_s3 = inlined_call_operand.vmem [shape: f32[2,1,16], index: 3, kind: input, shape index: {}]   ;;  %s4783_s4 = inlined_call_operand.vmem [shape: bf16[96,128], index: 4, kind: input, shape index: {}]   ;;  %s4784_s5 = inlined_call_operand.vmem [shape: f32[1,128], index: 5, kind: input, shape index: {}]   ;;  %s4785_s6 = inlined_call_operand.vmem [shape: bf16[2,128,1536], index: 6, kind: input, shape index: {}]   ;;  %s4786_s7 = inlined_call_operand.vmem [shape: f32[2,1,1536], index: 7, kind: input, shape index: {}]   ;;  %s4787_s8 = inlined_call_operand.vmem [shape: bf16[2,512,128], index: 8, kind: input, shape index: {}]   ;;  %s4788_s9 = inlined_call_operand.vmem [shape: f32[2,1,128], index: 9, kind: input, shape index: {}]   ;;  %s4789_s10 = inlined_call_operand.vmem [shape: f32[2,1,128], index: 10, kind: input, shape index: {}]   ;;  %s4790_s11 = inlined_call_operand.vmem [shape: f32[2,1,128], index: 11, kind: input, shape index: {}]   ;;  %s4791_s12 = inlined_call_operand.vmem [shape: bf16[2,128,128], index: 12, kind: input, shape index: {}]   ;;  %s4792_s13 = inlined_call_operand.vmem [shape: f32[2,1,128], index: 13, kind: input, shape index: {}]   ;;  %s4793_s14 = inlined_call_operand.vmem [shape: bf16[2,128,128], index: 14, kind: input, shape index: {}]   ;;  %s4794_s15 = inlined_call_operand.vmem [shape: f32[2,1,128], index: 15, kind: input, shape index: {}]   ;;  %s4795_s16 = inlined_call_operand.vmem [shape: f32[2,1,128], index: 16, kind: input, shape index: {}]   ;;  %s4796_s17 = inlined_call_operand.vmem [shape: f32[2,1,128], index: 17, kind: input, shape index: {}]   ;;  %s4797_s18 = inlined_call_operand.vmem [shape: f32[2,16,128], index: 18, kind: output, shape index: {}]  }
   0x1   :  { %4805 = sst [smem:[#allocation10_spill]] %s4779_s0  ;;  %s4186_s29 = smov 0  }
   0x2   :  { %4806 = sst [smem:[#allocation11_spill]] %s4780_s1  ;;  %s4188_s30 = smov 0  }
   0x3   :  { %4807 = sst [smem:[#allocation12_spill]] %s4781_s2  ;;  %s4190_s0 = smov 0  }
   0x4   :  { %4808 = sst [smem:[#allocation13_spill]] %s4782_s3 }
   0x5   :  { %4809 = sst [smem:[#allocation14_spill]] %s4783_s4 }
   0x6   :  { %4810 = sst [smem:[#allocation15_spill]] %s4784_s5 }
   0x7   :  { %4811 = sst [smem:[#allocation16_spill]] %s4785_s6 }
   0x8   :  { %4812 = sst [smem:[#allocation17_spill]] %s4786_s7 }
   0x9   :  { %4813 = sst [smem:[#allocation18_spill]] %s4787_s8 }
   0xa   :  { %4814 = sst [smem:[#allocation19_spill]] %s4790_s11 }
   0xb   :  { %4815 = sst [smem:[#allocation20_spill]] %s4791_s12 }
   0xc   :  { %4816 = sst [smem:[#allocation21_spill]] %s4792_s13 }
   0xd   :  { %4817 = sst [smem:[#allocation22_spill]] %s4795_s16 }
   0xe   :  { %4818 = sst [smem:[#allocation23_spill]] %s4796_s17 }
   0xf   :  { %4819 = sst [smem:[#allocation24_spill]] %s4797_s18 }
  0x10 LB: > { %4820 = sst [smem:[#allocation3_spill]] %s4063_s27  ;;  %s37_s19 = sadd.s32 1, %s4071_s29  ;;  %s4079_s0 = sphi %s4190_s0, %s28_s0   ;;  %s4075_s30 = sphi %s4188_s30, %s4861_s30   ;;  %s4071_s29 = sphi %s4186_s29, %s4860_s29   ;;  %s4067_s28 = sphi %s4184_s28, %s4859_s28   ;;  %s4063_s27 = sphi %s4182_s27, %s4858_s27  }
  0x11   : > { %4821 = sst [smem:[#allocation4_spill]] %s4071_s29  ;;  %s40_s1 = sadd.s32 1, %s4075_s30 }
  0x12   : > { %4822 = sst [smem:[#allocation5_spill]] %s4075_s30  ;;  %p38_p0 = scmp.ge.s32.totalorder %s37_s19, 2 }
  0x13   : > { %4823 = sst [smem:[#allocation6_spill]] %s4079_s0  ;;  %p3302_p1 = scmp.ge.s32.totalorder %s4079_s0, 1 }
  0x14   : > { %p647_p2 = scmp.lt.s32.totalorder %s4079_s0, 5  ;;  %s4863_s19 = smov (%p38_p0, %s37_s19), 0 }
  0x15   : > { %4824 = sst [smem:[#allocation7_spill]] %s4863_s19  ;;  %s4865_s1 = smov (!%p38_p0, %s40_s1), %s4075_s30 }
  0x16   : > { %p648_p3 = pnand %p3302_p1, %p647_p2  ;;  %p42_p4 = scmp.ge.s32.totalorder %s4865_s1, 2 }
  0x18   : > { %s4867_s1 = smov (%p42_p4, %s4865_s1), 0  ;;  %651 = sbr.rel (%p648_p3) target bundleno = 3099 (0xc1b), region = 92 }
  0x19   : > { %4825 = sst [smem:[#allocation8_spill]] %s4867_s1 }
  0x1f   : > { %p754_p5 = scmp.lt.s32.totalorder %s4067_s28, 1  ;;  %p767_p6 = scmp.lt.s32.totalorder %s4063_s27, 1 }
  0x20   : > { %s4827_s24 = sld [smem:[#allocation10_spill]]  ;;  %s4828_s19 = sld [smem:[#allocation12_spill]] }
  0x21   : > { %s4869_s28 = smov (!%p754_p5, %s4067_s28), 1  ;;  %s4830_s6 = sld [smem:[#allocation16_spill]] }
  0x22   : > { %4826 = sst [smem:[#allocation9_spill]] %s4869_s28  ;;  %s3484_s21 = sshll.u32 %s4869_s28, 3 }
  0x23   : > { %s4218_s20 = scalar_select %p767_p6, %s4063_s27, 1 }
  0x24   : > { %s3485_s22 = sshll.u32 %s4869_s28, 4  ;;  %s4831_s8 = sld [smem:[#allocation18_spill]] }
  0x25   : > { %s3751_s4 = smul.u32 768, %s4218_s20  ;;  %s3486_s18 = sshll.u32 %s4218_s20, 8 }
  0x26   : > { %s4225_s25 = scalar_lea.vmem %s4827_s24, %s3484_s21  ;;  %s4230_s30 = scalar_lea.vmem %s4828_s19, %s3485_s22 }
  0x27   : > { %s3752_s27 = smul.u32 12, %s4218_s20  ;;  %s4242_s21 = scalar_lea.vmem %s4830_s6, %s3751_s4 }
  0x28   : > { %s4832_s7 = sld [smem:[#allocation17_spill]]  ;;  %s3487_s2 = sshll.u32 %s4218_s20, 6 }
  0x29   : > { %s4835_s12 = sld [smem:[#allocation20_spill]]  ;;  %s4279_s5 = scalar_lea.vmem %s4793_s14, %s3487_s2 }
  0x2a   : > { %s4247_s1 = scalar_lea.vmem %s4831_s8, %s3486_s18  ;;  %s805_s4 = scalar_lea.vmem %s4794_s15, %s4218_s20 }
  0x2b   : > { %s4836_s16 = sld [smem:[#allocation22_spill]]  ;;  %s4837_s8 = sld [smem:[#allocation23_spill]] }
  0x2c   : > { %s4839_s0 = sld [smem:[#allocation3_spill]] }
  0x2e   : > { %s4252_s29 = scalar_lea.vmem %s4832_s7, %s3752_s27 }
  0x2f   : > { %s4274_s24 = scalar_lea.vmem %s4835_s12, %s3487_s2  ;;  %s4838_s12 = sld [smem:[#allocation24_spill]] }
  0x31   : > { %s808_s7 = scalar_lea.vmem %s4836_s16, %s4218_s20  ;;  %s811_s13 = scalar_lea.vmem %s4837_s8, %s4218_s20 }
  0x32   : > { %p3316_p7 = scmp.ne.s32.totalorder %s4839_s0, 0 }
  0x33   : > { %s4840_s3 = sld [smem:[#allocation14_spill]] (!%p3316_p7)  ;;  %v4081_v1 = vmov (!%p3316_p7), 0.0   ;;  %vm4082_vm0 = vmmov (!%p3316_p7), 0   ;;  %v4083_v3 = vmov (!%p3316_p7), 0   ;;  %v933_v5 = vld [vmem:[%s4230_s30] sm:$0xff] (!%p3316_p7)  ;;  %v934_v6 = vld [vmem:[%s4230_s30 + $0x8] sm:$0xff] (!%p3316_p7) }
  0x34   : > { %821 = sbr.rel (%p3316_p7) target bundleno = 301 (0x12d), region = 96  ;;  %3567 = vmatprep.subr.bf16.mxu0 (!%p3316_p7), %v4081_v1  ;;  %3579 = vmatprep.mubr.msk.bf16.mxu0 (!%p3316_p7), %vm4082_vm0, %v4081_v1  ;;  %vm935_vm1 = vcmp.gt.f32.partialorder (!%p3316_p7), %v933_v5, 0.5  ;;  %vm936_vm2 = vcmp.gt.f32.partialorder (!%p3316_p7), %v934_v6, 0.5  ;;  %v3806_v12 = vld [vmem:[%s4225_s25] sm:$0xff] (!%p3316_p7)   ;;  %vm884_vm3 = vcmask (!%p3316_p7), 785408   ;;  %s4841_s0 = sld [smem:[#allocation15_spill]] (!%p3316_p7) }
  0x35   : > { %s4296_s11 = scalar_lea.vmem %s4838_s12, %s3485_s22  ;;  %3799 = vset.pattern.permute.xlu0 (!%p3316_p7), %v4083_v3  ;;  %v937_v7 = vsel (!%p3316_p7), %vm935_vm1, 1, %v4083_v3  ;;  %v938_v9 = vsel (!%p3316_p7), %vm936_vm2, 1, %v4083_v3  ;;  %s4842_s6 = sld [smem:[#allocation11_spill]] (!%p3316_p7) }
  0x36   : > { %940 = vperm.xlu0 (!%p3316_p7), %3799, %v937_v7  }
  0x39   : > { %v3800_v0 = vld [vmem:[%s4840_s3] sm:$0xff] (!%p3316_p7)   ;;  %v3801_v2 = vld [vmem:[%s4840_s3 + $0x8] sm:$0xff] (!%p3316_p7)   ;;  %v3802_v4 = vld [vmem:[%s4840_s3 + $0x10] sm:$0xff] (!%p3316_p7)  }
  0x3a   : > { %3568 = vmatpush3.bf16.msra.mxu0 (!%p3316_p7), %v3800_v0  ;;  %v3803_v8 = vld [vmem:[%s4840_s3 + $0x18] sm:$0xff] (!%p3316_p7)   ;;  %v3804_v10 = vld [vmem:[%s4840_s3 + $0x20] sm:$0xff] (!%p3316_p7)   ;;  %943 = vperm.xlu0 (!%p3316_p7), %3799, %v938_v9   ;;  %v3805_v11 = vld [vmem:[%s4840_s3 + $0x28] sm:$0xff] (!%p3316_p7)  }
  0x3b   : > { %3569 = vmatprep.subr.bf16.mxu0 %v4081_v1  ;;  %v3317_v14 = vld [vmem:[%s4841_s0] ss:$0 sm:$0xff]  ;;  %v930_v20 = vld [vmem:[%s4842_s6 + $0x8] sm:$0xff] }
  0x3c   : > { %v929_v16 = vld [vmem:[%s4842_s6] sm:$0xff] }
  0x3e   : > { %3570 = vmatpush3.bf16.msra.mxu0 %v3801_v2 }
  0x3f   : > { %3571 = vmatprep.subr.bf16.mxu0 %v4081_v1 }
  0x42   : > { %3572 = vmatpush3.bf16.msra.mxu0 %v3802_v4 }
  0x43   : > { %3573 = vmatprep.subr.bf16.mxu0 %v4081_v1 }
  0x46   : > { %3574 = vmatpush3.bf16.msra.mxu0 %v3803_v8 }
  0x47   : > { %3575 = vmatprep.subr.bf16.mxu0 %v4081_v1 }
  0x4a   : > { %3576 = vmatpush3.bf16.msra.mxu0 %v3804_v10 }
  0x4b   : > { %3577 = vmatprep.subr.bf16.mxu0 %v4081_v1 }
  0x4e   : > { %3578 = vmatpush3.bf16.msra.mxu0 %v3805_v11 }
  0x51   : > { %3580 = vmatmul.mubr.msk.bf16.vlgmr.msra.gmra.mrb[0].mxu0 %vm884_vm3, %v3806_v12 }
  0xb5   : > { %v941_v13 = vpop.permute.xlu0 %940 }
  0xb6   : > { %vm945_vm4 = vcmp.eq.s32.totalorder %v941_v13, 1 }
  0xb9   : > { %v944_v22 = vpop.permute.xlu0 %943 }
  0xba   : > { %vm946_vm5 = vcmp.eq.s32.totalorder %v944_v22, 1 }
 0x124   : > { %v922_v15 = vpop.f32.mrb[0].mxu0 }
 0x125   : > { %v923_v17 = vadd.f32 %v3317_v14, %v922_v15  ;;  %v3581_v18 = vpop.f32.mrb[1].mxu0 }
 0x126   : > { %v925_v19 = vpop.f32.mrb[2].mxu0 }
 0x127   : > { %v931_v21 = vadd.f32 %v929_v16, %v923_v17  ;;  %v926_v23 = vadd.f32 %v3317_v14, %v925_v19  ;;  %v3582_v24 = vpop.f32.mrb[3].mxu0 }
 0x129   : > { %v947_v25 = vsel %vm945_vm4, %v931_v21, 0.0  ;;  %v932_v26 = vadd.f32 %v930_v20, %v926_v23 }
 0x12a   : > { %949 = vst [vmem:[#allocation2] sm:$0xff] %v947_v25 }
 0x12b   : > { %v948_v27 = vsel %vm946_vm5, %v932_v26, 0.0 }
 0x12c   : > { %950 = vst [vmem:[#allocation2 + $0x8] sm:$0xff] %v948_v27 }
 0x12d PF: > { %v3807_v28 = vld [vmem:[%s4242_s21 + $0x4] ss:$48 sps:$4 sm:$0xff]   ;;  %v3809_v29 = vld [vmem:[%s4242_s21] ss:$48 sps:$4 sm:$0xff]   ;;  %v4084_v30 = vmov 0   ;;  %vm4086_vm6 = vmmov 0   ;;  %s4848_s18 = scalar_lea.vmem %s4788_s9, %s4218_s20  ;;  %s4849_s30 = scalar_lea.vmem %s4789_s10, %s4218_s20 }
 0x12e   : > { %1626 = vmatprep.mubr.bf16.mxu0 %v4084_v30  ;;  %1669 = vmatprep.mubr.bf16.mxu1 %v4084_v30  ;;  %v3810_v31 = vld [vmem:[%s4242_s21 + $0x64] ss:$48 sps:$4 sm:$0xff]   ;;  %v3812_v32 = vld [vmem:[%s4242_s21 + $0x60] ss:$48 sps:$4 sm:$0xff]   ;;  %v3855_v43 = vld [vmem:[%s4242_s21 + $0xc] ss:$48 sps:$4 sm:$0xff]  }
 0x12f   : > { %1594 = vmatprep.subr.bf16.mxu0 %v3807_v28  ;;  %v3813_v33 = vld [vmem:[%s4242_s21 + $0xc4] ss:$48 sps:$4 sm:$0xff]   ;;  %v3815_v34 = vld [vmem:[%s4242_s21 + $0xc0] ss:$48 sps:$4 sm:$0xff]   ;;  %v3857_v44 = vld [vmem:[%s4242_s21 + $0x8] ss:$48 sps:$4 sm:$0xff]   ;;  %1637 = vmatprep.subr.bf16.mxu1 %v3855_v43 }
 0x130   : > { %1595 = vmatpush1.bf16.msra.mxu0 %v3809_v29  ;;  %v3816_v35 = vld [vmem:[%s4242_s21 + $0x124] ss:$48 sps:$4 sm:$0xff]   ;;  %v3818_v36 = vld [vmem:[%s4242_s21 + $0x120] ss:$48 sps:$4 sm:$0xff]   ;;  %v3858_v46 = vld [vmem:[%s4242_s21 + $0x6c] ss:$48 sps:$4 sm:$0xff]   ;;  %1638 = vmatpush1.bf16.msra.mxu1 %v3857_v44 }
 0x131   : > { %1596 = vmatprep.subr.bf16.mxu0 %v3810_v31  ;;  %v3819_v37 = vld [vmem:[%s4242_s21 + $0x184] ss:$48 sps:$4 sm:$0xff]   ;;  %v3821_v38 = vld [vmem:[%s4242_s21 + $0x180] ss:$48 sps:$4 sm:$0xff]   ;;  %v3860_v49 = vld [vmem:[%s4242_s21 + $0x68] ss:$48 sps:$4 sm:$0xff]   ;;  %1639 = vmatprep.subr.bf16.mxu1 %v3858_v46 }
 0x132   : > { %v3822_v39 = vld [vmem:[%s4242_s21 + $0x1e4] ss:$48 sps:$4 sm:$0xff]   ;;  %v3824_v40 = vld [vmem:[%s4242_s21 + $0x1e0] ss:$48 sps:$4 sm:$0xff]   ;;  %v3861_v50 = vld [vmem:[%s4242_s21 + $0xcc] ss:$48 sps:$4 sm:$0xff]  }
 0x133   : > { %v3825_v41 = vld [vmem:[%s4242_s21 + $0x244] ss:$48 sps:$4 sm:$0xff]   ;;  %v3827_v42 = vld [vmem:[%s4242_s21 + $0x240] ss:$48 sps:$4 sm:$0xff]   ;;  %v952_v51 = vld [vmem:[#allocation2 + $0x8] sm:$0xff]  ;;  %s4843_s25 = sld [smem:[#allocation9_spill]] }
 0x134   : > { %1597 = vmatpush1.bf16.msra.mxu0 %v3812_v32  ;;  %v3828_v45 = vld [vmem:[%s4242_s21 + $0x2a4] ss:$48 sps:$4 sm:$0xff]   ;;  %v3830_v47 = vld [vmem:[%s4242_s21 + $0x2a0] ss:$48 sps:$4 sm:$0xff]   ;;  %1640 = vmatpush1.bf16.msra.mxu1 %v3860_v49  ;;  %v3863_v53 = vld [vmem:[%s4242_s21 + $0xc8] ss:$48 sps:$4 sm:$0xff]  }
 0x135   : > { %1598 = vmatprep.subr.bf16.mxu0 %v3813_v33  ;;  %v951_v48 = vld [vmem:[#allocation2] sm:$0xff]  ;;  %1641 = vmatprep.subr.bf16.mxu1 %v3861_v50  ;;  %v3864_v55 = vld [vmem:[%s4242_s21 + $0x12c] ss:$48 sps:$4 sm:$0xff]   ;;  %v3866_v58 = vld [vmem:[%s4242_s21 + $0x128] ss:$48 sps:$4 sm:$0xff]   ;;  %s4844_s12 = sld [smem:[#allocation13_spill]] }
 0x136   : > { %v3833_v52 = vld [vmem:[%s4242_s21 + $0x14] ss:$48 sps:$4 sm:$0xff]   ;;  %v4354_v54 = vpack.c.bf16 %v952_v51, %v951_v48  ;;  %v3831_v56 = vld [vmem:[%s4242_s21 + $0x10] ss:$48 sps:$4 sm:$0xff]   ;;  %v3867_v59 = vld [vmem:[%s4242_s21 + $0x18c] ss:$48 sps:$4 sm:$0xff]  }
 0x137   : > { %v3836_v57 = vld [vmem:[%s4242_s21 + $0x74] ss:$48 sps:$4 sm:$0xff]   ;;  %v3834_v60 = vld [vmem:[%s4242_s21 + $0x70] ss:$48 sps:$4 sm:$0xff]   ;;  %v3869_v62 = vld [vmem:[%s4242_s21 + $0x188] ss:$48 sps:$4 sm:$0xff]  }
 0x138   : > { %1599 = vmatpush1.bf16.msra.mxu0 %v3815_v34  ;;  %1642 = vmatpush1.bf16.msra.mxu1 %v3863_v53  ;;  %v3839_v61 = vld [vmem:[%s4242_s21 + $0xd4] ss:$48 sps:$4 sm:$0xff]   ;;  %v3870_v63 = vld [vmem:[%s4242_s21 + $0x1ec] ss:$48 sps:$4 sm:$0xff]   ;;  %v3837_v0 = vld [vmem:[%s4242_s21 + $0xd0] ss:$48 sps:$4 sm:$0xff]  }
 0x139   : > { %1600 = vmatprep.subr.bf16.mxu0 %v3816_v35  ;;  %1643 = vmatprep.subr.bf16.mxu1 %v3864_v55  ;;  %v3842_v1 = vld [vmem:[%s4242_s21 + $0x134] ss:$48 sps:$4 sm:$0xff]   ;;  %v3840_v2 = vld [vmem:[%s4242_s21 + $0x130] ss:$48 sps:$4 sm:$0xff]   ;;  %v3872_v3 = vld [vmem:[%s4242_s21 + $0x1e8] ss:$48 sps:$4 sm:$0xff]  }
 0x13a   : > { %v3873_v4 = vld [vmem:[%s4242_s21 + $0x24c] ss:$48 sps:$4 sm:$0xff]   ;;  %v3845_v5 = vld [vmem:[%s4242_s21 + $0x194] ss:$48 sps:$4 sm:$0xff]   ;;  %v3875_v6 = vld [vmem:[%s4242_s21 + $0x248] ss:$48 sps:$4 sm:$0xff]  }
 0x13b   : > { %v3876_v7 = vld [vmem:[%s4242_s21 + $0x2ac] ss:$48 sps:$4 sm:$0xff]   ;;  %v3843_v8 = vld [vmem:[%s4242_s21 + $0x190] ss:$48 sps:$4 sm:$0xff]   ;;  %v3848_v9 = vld [vmem:[%s4242_s21 + $0x1f4] ss:$48 sps:$4 sm:$0xff]   ;;  %s4845_s22 = scalar_lea.vmem %s4844_s12, %s4843_s25 }
 0x13c   : > { %1601 = vmatpush1.bf16.msra.mxu0 %v3818_v36  ;;  %1644 = vmatpush1.bf16.msra.mxu1 %v3866_v58  ;;  %v3878_v10 = vld [vmem:[%s4242_s21 + $0x2a8] ss:$48 sps:$4 sm:$0xff]   ;;  %v3881_v11 = vld [vmem:[%s4242_s21 + $0x1c] ss:$48 sps:$4 sm:$0xff]   ;;  %v3846_v12 = vld [vmem:[%s4242_s21 + $0x1f0] ss:$48 sps:$4 sm:$0xff]  }
 0x13d   : > { %1602 = vmatprep.subr.bf16.mxu0 %v3819_v37  ;;  %1645 = vmatprep.subr.bf16.mxu1 %v3867_v59  ;;  %v3851_v13 = vld [vmem:[%s4242_s21 + $0x254] ss:$48 sps:$4 sm:$0xff]   ;;  %v3879_v14 = vld [vmem:[%s4242_s21 + $0x18] ss:$48 sps:$4 sm:$0xff]   ;;  %v3884_v15 = vld [vmem:[%s4242_s21 + $0x7c] ss:$48 sps:$4 sm:$0xff]  }
 0x13e   : > { %v3849_v16 = vld [vmem:[%s4242_s21 + $0x250] ss:$48 sps:$4 sm:$0xff]   ;;  %v3854_v17 = vld [vmem:[%s4242_s21 + $0x2b4] ss:$48 sps:$4 sm:$0xff]   ;;  %v3882_v18 = vld [vmem:[%s4242_s21 + $0x78] ss:$48 sps:$4 sm:$0xff]  }
 0x13f   : > { %v3887_v19 = vld [vmem:[%s4242_s21 + $0xdc] ss:$48 sps:$4 sm:$0xff]   ;;  %v3852_v20 = vld [vmem:[%s4242_s21 + $0x2b0] ss:$48 sps:$4 sm:$0xff]   ;;  %v3885_v21 = vld [vmem:[%s4242_s21 + $0xd8] ss:$48 sps:$4 sm:$0xff]  }
 0x140   : > { %1603 = vmatpush1.bf16.msra.mxu0 %v3821_v38  ;;  %1646 = vmatpush1.bf16.msra.mxu1 %v3869_v62  ;;  %v3890_v22 = vld [vmem:[%s4242_s21 + $0x13c] ss:$48 sps:$4 sm:$0xff]   ;;  %v3888_v23 = vld [vmem:[%s4242_s21 + $0x138] ss:$48 sps:$4 sm:$0xff]   ;;  %v3905_v33 = vld [vmem:[%s4242_s21 + $0x24] ss:$48 sps:$4 sm:$0xff]  }
 0x141   : > { %1604 = vmatprep.subr.bf16.mxu0 %v3822_v39  ;;  %1647 = vmatprep.subr.bf16.mxu1 %v3870_v63  ;;  %v3893_v24 = vld [vmem:[%s4242_s21 + $0x19c] ss:$48 sps:$4 sm:$0xff]   ;;  %v3891_v25 = vld [vmem:[%s4242_s21 + $0x198] ss:$48 sps:$4 sm:$0xff]   ;;  %v3903_v34 = vld [vmem:[%s4242_s21 + $0x20] ss:$48 sps:$4 sm:$0xff]  }
 0x142   : > { %v3896_v26 = vld [vmem:[%s4242_s21 + $0x1fc] ss:$48 sps:$4 sm:$0xff]   ;;  %v3894_v27 = vld [vmem:[%s4242_s21 + $0x1f8] ss:$48 sps:$4 sm:$0xff]   ;;  %v3911_v37 = vld [vmem:[%s4242_s21 + $0x84] ss:$48 sps:$4 sm:$0xff]  }
 0x143   : > { %v3899_v28 = vld [vmem:[%s4242_s21 + $0x25c] ss:$48 sps:$4 sm:$0xff]   ;;  %v3897_v29 = vld [vmem:[%s4242_s21 + $0x258] ss:$48 sps:$4 sm:$0xff]   ;;  %v3909_v38 = vld [vmem:[%s4242_s21 + $0x80] ss:$48 sps:$4 sm:$0xff]  }
 0x144   : > { %1605 = vmatpush1.bf16.msra.mxu0 %v3824_v40  ;;  %1648 = vmatpush1.bf16.msra.mxu1 %v3872_v3  ;;  %v3902_v31 = vld [vmem:[%s4242_s21 + $0x2bc] ss:$48 sps:$4 sm:$0xff]   ;;  %v3900_v32 = vld [vmem:[%s4242_s21 + $0x2b8] ss:$48 sps:$4 sm:$0xff]   ;;  %v3929_v49 = vld [vmem:[%s4242_s21 + $0x1a4] ss:$48 sps:$4 sm:$0xff]   ;;  %v1054_v3 = vlaneseq }
 0x145   : > { %1606 = vmatprep.subr.bf16.mxu0 %v3825_v41  ;;  %1649 = vmatprep.subr.bf16.mxu1 %v3873_v4  ;;  %v3908_v35 = vld [vmem:[%s4242_s21 + $0x2c] ss:$48 sps:$4 sm:$0xff]   ;;  %v3906_v36 = vld [vmem:[%s4242_s21 + $0x28] ss:$48 sps:$4 sm:$0xff]   ;;  %v3915_v41 = vld [vmem:[%s4242_s21 + $0xe0] ss:$48 sps:$4 sm:$0xff]  }
 0x146   : > { %v3914_v39 = vld [vmem:[%s4242_s21 + $0x8c] ss:$48 sps:$4 sm:$0xff]   ;;  %v3912_v40 = vld [vmem:[%s4242_s21 + $0x88] ss:$48 sps:$4 sm:$0xff]   ;;  %v3927_v51 = vld [vmem:[%s4242_s21 + $0x1a0] ss:$48 sps:$4 sm:$0xff]  }
 0x147   : > { %v3918_v43 = vld [vmem:[%s4242_s21 + $0xe8] ss:$48 sps:$4 sm:$0xff]   ;;  %v3920_v44 = vld [vmem:[%s4242_s21 + $0xec] ss:$48 sps:$4 sm:$0xff]   ;;  %v3935_v53 = vld [vmem:[%s4242_s21 + $0x204] ss:$48 sps:$4 sm:$0xff]  }
 0x148   : > { %1607 = vmatpush1.bf16.msra.mxu0 %v3827_v42  ;;  %1650 = vmatpush1.bf16.msra.mxu1 %v3875_v6  ;;  %v3917_v42 = vld [vmem:[%s4242_s21 + $0xe4] ss:$48 sps:$4 sm:$0xff]   ;;  %v3926_v46 = vld [vmem:[%s4242_s21 + $0x14c] ss:$48 sps:$4 sm:$0xff]   ;;  %v3924_v48 = vld [vmem:[%s4242_s21 + $0x148] ss:$48 sps:$4 sm:$0xff]  }
 0x149   : > { %1608 = vmatprep.subr.bf16.mxu0 %v3828_v45  ;;  %1651 = vmatprep.subr.bf16.mxu1 %v3876_v7  ;;  %v3923_v45 = vld [vmem:[%s4242_s21 + $0x144] ss:$48 sps:$4 sm:$0xff]   ;;  %v3932_v50 = vld [vmem:[%s4242_s21 + $0x1ac] ss:$48 sps:$4 sm:$0xff]   ;;  %v4445_v4 = vshrl.u32 %v1054_v3, 7  ;;  %vm1907_vm9 = vcmask 130048  }
 0x14a   : > { %v3938_v55 = vld [vmem:[%s4242_s21 + $0x20c] ss:$48 sps:$4 sm:$0xff]   ;;  %v3941_v58 = vld [vmem:[%s4242_s21 + $0x264] ss:$48 sps:$4 sm:$0xff]   ;;  %s4850_s27 = sld [smem:[#allocation19_spill]]  ;;  %s4852_s16 = sld [smem:[#allocation21_spill]] }
 0x14b   : > { %v3944_v59 = vld [vmem:[%s4242_s21 + $0x26c] ss:$48 sps:$4 sm:$0xff]   ;;  %v3947_v62 = vld [vmem:[%s4242_s21 + $0x2c4] ss:$48 sps:$4 sm:$0xff]   ;;  %s4856_s17 = sld [smem:[#allocation3_spill]] }
 0x14c   : > { %1609 = vmatpush1.bf16.msra.mxu0 %v3830_v47  ;;  %1652 = vmatpush1.bf16.msra.mxu1 %v3878_v10  ;;  %v3921_v47 = vld [vmem:[%s4242_s21 + $0x140] ss:$48 sps:$4 sm:$0xff]   ;;  %v3950_v63 = vld [vmem:[%s4242_s21 + $0x2cc] ss:$48 sps:$4 sm:$0xff]  }
 0x14d   : > { %1680 = vmatprep.subr.bf16.mxu0 %v3833_v52  ;;  %1723 = vmatprep.subr.bf16.mxu1 %v3881_v11  ;;  %v3930_v52 = vld [vmem:[%s4242_s21 + $0x1a8] ss:$48 sps:$4 sm:$0xff]   ;;  %v1050_v6 = vld [vmem:[%s4252_s29] sm:$0xff] }
 0x14f   : > { %1627 = vmatmul.mubr.bf16.vlgmr.msra.gmra.mrb[0].mxu0 %v4354_v54  ;;  %1670 = vmatmul.mubr.bf16.vlgmr.msra.gmra.mrb[0].mxu1 %v4354_v54 }
 0x150   : > { %1681 = vmatpush1.bf16.msra.mxu0 %v3831_v56  ;;  %1712 = vmatprep.mubr.bf16.mxu0 %v4084_v30  ;;  %v3933_v56 = vld [vmem:[%s4242_s21 + $0x200] ss:$48 sps:$4 sm:$0xff]   ;;  %s4851_s0 = scalar_lea.vmem %s4850_s27, %s4218_s20  ;;  %s4853_s8 = scalar_lea.vmem %s4852_s16, %s4218_s20 }
 0x151   : > { %1682 = vmatprep.subr.bf16.mxu0 %v3836_v57  ;;  %1724 = vmatpush1.bf16.msra.mxu1 %v3879_v14  ;;  %v3936_v57 = vld [vmem:[%s4242_s21 + $0x208] ss:$48 sps:$4 sm:$0xff]   ;;  %p3481_p8 = scmp.ne.s32.totalorder %s4856_s17, 1 }
 0x152   : > { %1755 = vmatprep.mubr.bf16.mxu1 %v4084_v30  ;;  %1725 = vmatprep.subr.bf16.mxu1 %v3884_v15 }
 0x154   : > { %1683 = vmatpush1.bf16.msra.mxu0 %v3834_v60  ;;  %v3939_v60 = vld [vmem:[%s4242_s21 + $0x260] ss:$48 sps:$4 sm:$0xff]  }
 0x155   : > { %1684 = vmatprep.subr.bf16.mxu0 %v3839_v61  ;;  %1726 = vmatpush1.bf16.msra.mxu1 %v3882_v18  ;;  %v3942_v61 = vld [vmem:[%s4242_s21 + $0x268] ss:$48 sps:$4 sm:$0xff]  }
 0x156   : > { %1727 = vmatprep.subr.bf16.mxu1 %v3887_v19  ;;  %v1064_v19 = vsub.s32 2, %v4445_v4 }
 0x158   : > { %1685 = vmatpush1.bf16.msra.mxu0 %v3837_v0  ;;  %v3945_v0 = vld [vmem:[%s4242_s21 + $0x2c0] ss:$48 sps:$4 sm:$0xff]  }
 0x159   : > { %1686 = vmatprep.subr.bf16.mxu0 %v3842_v1  ;;  %1728 = vmatpush1.bf16.msra.mxu1 %v3885_v21  ;;  %v3948_v1 = vld [vmem:[%s4242_s21 + $0x2c8] ss:$48 sps:$4 sm:$0xff]   ;;  %v1065_v21 = vrot.slane %v1050_v6, %v1064_v19 }
 0x15a   : > { %1729 = vmatprep.subr.bf16.mxu1 %v3890_v22 }
 0x15c   : > { %1687 = vmatpush1.bf16.msra.mxu0 %v3840_v2  ;;  %v4085_v2 = vmov 0.0  }
 0x15d   : > { %1688 = vmatprep.subr.bf16.mxu0 %v3845_v5  ;;  %1730 = vmatpush1.bf16.msra.mxu1 %v3888_v23  ;;  %v4448_v5 = vsub.s32 0, %v4445_v4 }
 0x15e   : > { %1731 = vmatprep.subr.bf16.mxu1 %v3893_v24 }
 0x15f   : > { %v1057_v7 = vrot.slane %v1050_v6, %v4448_v5 }
 0x160   : > { %1689 = vmatpush1.bf16.msra.mxu0 %v3843_v8 }
 0x161   : > { %1690 = vmatprep.subr.bf16.mxu0 %v3848_v9  ;;  %1732 = vmatpush1.bf16.msra.mxu1 %v3891_v25 }
 0x162   : > { %1733 = vmatprep.subr.bf16.mxu1 %v3896_v26 }
 0x164   : > { %1691 = vmatpush1.bf16.msra.mxu0 %v3846_v12 }
 0x165   : > { %1692 = vmatprep.subr.bf16.mxu0 %v3851_v13  ;;  %1734 = vmatpush1.bf16.msra.mxu1 %v3894_v27 }
 0x166   : > { %1735 = vmatprep.subr.bf16.mxu1 %v3899_v28 }
 0x168   : > { %1693 = vmatpush1.bf16.msra.mxu0 %v3849_v16 }
 0x169   : > { %1694 = vmatprep.subr.bf16.mxu0 %v3854_v17  ;;  %1736 = vmatpush1.bf16.msra.mxu1 %v3897_v29 }
 0x16a   : > { %1737 = vmatprep.subr.bf16.mxu1 %v3902_v31 }
 0x16c   : > { %1695 = vmatpush1.bf16.msra.mxu0 %v3852_v20  ;;  %v1068_v20 = vsub.s32 3, %v4445_v4 }
 0x16d   : > { %1738 = vmatpush1.bf16.msra.mxu1 %v3900_v32  ;;  %1766 = vmatprep.subr.bf16.mxu0 %v3905_v33  ;;  %v1072_v32 = vsub.s32 4, %v4445_v4 }
 0x16e   : > { %1809 = vmatprep.subr.bf16.mxu1 %v3908_v35  ;;  %v1069_v22 = vrot.slane %v1050_v6, %v1068_v20 }
 0x16f   : > { %1713 = vmatmul.mubr.bf16.vlgmr.msra.gmra.mrb[4].mxu0 %v4354_v54 }
 0x170   : > { %1798 = vmatprep.mubr.bf16.mxu0 %v4084_v30  ;;  %1756 = vmatmul.mubr.bf16.vlgmr.msra.gmra.mrb[4].mxu1 %v4354_v54 }
 0x171   : > { %1841 = vmatprep.mubr.bf16.mxu1 %v4084_v30  ;;  %1767 = vmatpush1.bf16.msra.mxu0 %v3903_v34  ;;  %v1076_v34 = vsub.s32 5, %v4445_v4 }
 0x172   : > { %1810 = vmatpush1.bf16.msra.mxu1 %v3906_v36  ;;  %1768 = vmatprep.subr.bf16.mxu0 %v3911_v37  ;;  %v1073_v36 = vrot.slane %v1050_v6, %v1072_v32 }
 0x173   : > { %1811 = vmatprep.subr.bf16.mxu1 %v3914_v39 }
 0x175   : > { %1769 = vmatpush1.bf16.msra.mxu0 %v3909_v38  ;;  %v1077_v38 = vrot.slane %v1050_v6, %v1076_v34  ;;  %v3971_v34 = vld [vmem:[%s4247_s1 + $0xc8] sm:$0xff]  }
 0x176   : > { %1812 = vmatpush1.bf16.msra.mxu1 %v3912_v40  ;;  %1770 = vmatprep.subr.bf16.mxu0 %v3917_v42 }
 0x177   : > { %1813 = vmatprep.subr.bf16.mxu1 %v3920_v44 }
 0x179   : > { %1771 = vmatpush1.bf16.msra.mxu0 %v3915_v41 }
 0x17a   : > { %1814 = vmatpush1.bf16.msra.mxu1 %v3918_v43  ;;  %1772 = vmatprep.subr.bf16.mxu0 %v3923_v45 }
 0x17b   : > { %1815 = vmatprep.subr.bf16.mxu1 %v3926_v46 }
 0x17d   : > { %1773 = vmatpush1.bf16.msra.mxu0 %v3921_v47 }
 0x17e   : > { %1816 = vmatpush1.bf16.msra.mxu1 %v3924_v48  ;;  %1774 = vmatprep.subr.bf16.mxu0 %v3929_v49  ;;  %v1080_v48 = vsub.s32 6, %v4445_v4  ;;  %v1084_v49 = vsub.s32 7, %v4445_v4 }
 0x17f   : > { %1817 = vmatprep.subr.bf16.mxu1 %v3932_v50 }
 0x180   : > { %v1081_v50 = vrot.slane %v1050_v6, %v1080_v48 }
 0x181   : > { %1775 = vmatpush1.bf16.msra.mxu0 %v3927_v51  ;;  %v1085_v51 = vrot.slane %v1050_v6, %v1084_v49 }
 0x182   : > { %1818 = vmatpush1.bf16.msra.mxu1 %v3930_v52  ;;  %1776 = vmatprep.subr.bf16.mxu0 %v3935_v53 }
 0x183   : > { %1819 = vmatprep.subr.bf16.mxu1 %v3938_v55 }
 0x185   : > { %1777 = vmatpush1.bf16.msra.mxu0 %v3933_v56 }
 0x186   : > { %1820 = vmatpush1.bf16.msra.mxu1 %v3936_v57  ;;  %1778 = vmatprep.subr.bf16.mxu0 %v3941_v58 }
 0x187   : > { %1821 = vmatprep.subr.bf16.mxu1 %v3944_v59 }
 0x189   : > { %1779 = vmatpush1.bf16.msra.mxu0 %v3939_v60 }
 0x18a   : > { %1822 = vmatpush1.bf16.msra.mxu1 %v3942_v61  ;;  %1780 = vmatprep.subr.bf16.mxu0 %v3947_v62 }
 0x18b   : > { %1823 = vmatprep.subr.bf16.mxu1 %v3950_v63  ;;  %v1051_v63 = vld [vmem:[%s4252_s29 + $0x8] sm:$0xf] }
 0x18c   : > { %v1097_v3 = vrot.slane %v1051_v63, %v1064_v19 }
 0x18d   : > { %1781 = vmatpush1.bf16.msra.mxu0 %v3945_v0  ;;  %v1089_v0 = vrot.slane %v1051_v63, %v4448_v5 }
 0x18e   : > { %1824 = vmatpush1.bf16.msra.mxu1 %v3948_v1  ;;  %3583 = vmatprep.subr.bf16.mxu0 %v4085_v2 }
 0x18f   : > { %3615 = vmatprep.subr.bf16.mxu1 %v4085_v2 }
 0x190   : > { %1799 = vmatmul.mubr.bf16.vlgmr.msra.gmra.mrb[8].mxu0 %v4354_v54 }
 0x191   : > { %1842 = vmatmul.mubr.bf16.vlgmr.msra.gmra.mrb[8].mxu1 %v4354_v54  ;;  %3585 = vmatprep.mubr.msk.bf16.mxu0 %vm4086_vm6, %v4085_v2  ;;  %v1060_v54 = vsub.s32 1, %v4445_v4 }
 0x192   : > { %3617 = vmatprep.mubr.msk.bf16.mxu1 %vm4086_vm6, %v4085_v2 }
 0x193   : > { %v1061_v9 = vrot.slane %v1050_v6, %v1060_v54  ;;  %v1093_v1 = vrot.slane %v1051_v63, %v1060_v54  ;;  %v1101_v6 = vrot.slane %v1051_v63, %v1068_v20 }
 0x222   : > { %v1628_v8 = vpop.f32.mrb[0].mxu0  ;;  %v1671_v23 = vpop.f32.mrb[0].mxu1 }
 0x223   : > { %v1629_v10 = vadd.f32 %v1628_v8, %v1057_v7  ;;  %v1630_v11 = vpop.f32.mrb[1].mxu0  ;;  %v4457_v24 = vadd.f32 %v1671_v23, %v1065_v21  ;;  %v1673_v25 = vpop.f32.mrb[1].mxu1 }
 0x224   : > { %v1632_v12 = vpop.f32.mrb[2].mxu0  ;;  %v1631_v15 = vadd.f32 %v1630_v11, %v1061_v9  ;;  %v4459_v26 = vadd.f32 %v1673_v25, %v1069_v22  ;;  %v1675_v27 = vpop.f32.mrb[2].mxu1 }
 0x225   : > { %v1633_v13 = vadd.f32 %v1632_v12, %v1057_v7  ;;  %v1634_v14 = vpop.f32.mrb[3].mxu0  ;;  %v4461_v28 = vadd.f32 %v1675_v27, %v1065_v21  ;;  %v1677_v29 = vpop.f32.mrb[3].mxu1  ;;  %v1852_v27 = vld [vmem:[%s4845_s22] sm:$0x1] }
 0x226   : > { %v1635_v16 = vadd.f32 %v1634_v14, %v1061_v9  ;;  %v4463_v31 = vadd.f32 %v1677_v29, %v1069_v22  ;;  %vm1853_vm7 = vcmp.gt.f32.partialorder %v1852_v27, 0.5 }
 0x227   : > { %v1855_v17 = vpack.c.bf16 %v1633_v13, %v1629_v10  ;;  %v2314_v33 = vpack.c.bf16 %v4461_v28, %v4457_v24  ;;  %v1899_v29 = vsel %vm1853_vm7, 1, %v4084_v30  ;;  %v3431_v24 = vld [vmem:[%s4848_s18] ss:$0 sm:$0xff] }
 0x228   : > { %v2091_v18 = vpack.c.bf16 %v1635_v16, %v1631_v15  ;;  %v2537_v35 = vpack.c.bf16 %v4463_v31, %v4459_v26  ;;  %v1903_v32 = vrot.slane %v1899_v29, %v4448_v5 }
 0x22a   : > { %vm4516_vm8 = vcmp.eq.s32.totalorder %v1903_v32, 1 }
 0x242   : > { %v1714_v37 = vpop.f32.mrb[4].mxu0 }
 0x243   : > { %v1716_v39 = vpop.f32.mrb[5].mxu0  ;;  %v1715_v41 = vadd.f32 %v1714_v37, %v1073_v36  ;;  %v1757_v52 = vpop.f32.mrb[4].mxu1 }
 0x244   : > { %v1718_v40 = vpop.f32.mrb[6].mxu0  ;;  %v1717_v44 = vadd.f32 %v1716_v39, %v1077_v38  ;;  %v4479_v53 = vadd.f32 %v1757_v52, %v1081_v50  ;;  %v1759_v55 = vpop.f32.mrb[5].mxu1 }
 0x245   : > { %v1719_v42 = vadd.f32 %v1718_v40, %v1073_v36  ;;  %v1720_v43 = vpop.f32.mrb[7].mxu0  ;;  %v4481_v56 = vadd.f32 %v1759_v55, %v1085_v51  ;;  %v1761_v57 = vpop.f32.mrb[6].mxu1 }
 0x246   : > { %v1721_v45 = vadd.f32 %v1720_v43, %v1077_v38  ;;  %v4483_v58 = vadd.f32 %v1761_v57, %v1081_v50  ;;  %v1763_v59 = vpop.f32.mrb[7].mxu1 }
 0x247   : > { %v1856_v46 = vpack.c.bf16 %v1719_v42, %v1715_v41  ;;  %v4485_v60 = vadd.f32 %v1763_v59, %v1085_v51 }
 0x248   : > { %v2092_v47 = vpack.c.bf16 %v1721_v45, %v1717_v44  ;;  %v2315_v61 = vpack.c.bf16 %v4483_v58, %v4479_v53 }
 0x249   : > { %3584 = vmatpush3.bf16.xpose.msra.mxu0 %v1856_v46  ;;  %v2538_v62 = vpack.c.bf16 %v4485_v60, %v4481_v56 }
 0x24a   : > { %3616 = vmatpush3.bf16.xpose.msra.mxu1 %v2092_v47  ;;  %3589 = vmatprep.subr.bf16.mxu0 %v4085_v2 }
 0x24b   : > { %3621 = vmatprep.subr.bf16.mxu1 %v4085_v2 }
 0x250   : > { %3586 = vmatmul.mubr.bf16.vlgmr.msra.gmra.mrb[12].mxu0 %v1855_v17 }
 0x251   : > { %3618 = vmatmul.mubr.bf16.vlgmr.msra.gmra.mrb[12].mxu1 %v2091_v18  ;;  %3591 = vmatprep.mubr.msk.bf16.mxu0 %vm4086_vm6, %v4085_v2 }
 0x252   : > { %3623 = vmatprep.mubr.msk.bf16.mxu1 %vm4086_vm6, %v4085_v2 }
 0x263   : > { %v1800_v7 = vpop.f32.mrb[8].mxu0 }
 0x264   : > { %v1801_v8 = vadd.f32 %v1800_v7, %v1089_v0  ;;  %v1802_v9 = vpop.f32.mrb[9].mxu0  ;;  %v1843_v10 = vpop.f32.mrb[8].mxu1 }
 0x265   : > { %v1803_v11 = vadd.f32 %v1802_v9, %v1093_v1  ;;  %v1804_v12 = vpop.f32.mrb[10].mxu0  ;;  %v4495_v13 = vadd.f32 %v1843_v10, %v1097_v3  ;;  %v1845_v14 = vpop.f32.mrb[9].mxu1 }
 0x266   : > { %v1805_v15 = vadd.f32 %v1804_v12, %v1089_v0  ;;  %v1806_v16 = vpop.f32.mrb[11].mxu0  ;;  %v4497_v17 = vadd.f32 %v1845_v14, %v1101_v6  ;;  %v1847_v18 = vpop.f32.mrb[10].mxu1 }
 0x267   : > { %v1807_v21 = vadd.f32 %v1806_v16, %v1093_v1  ;;  %v4499_v4 = vadd.f32 %v1847_v18, %v1097_v3  ;;  %v1849_v54 = vpop.f32.mrb[11].mxu1 }
 0x268   : > { %v1857_v19 = vpack.c.bf16 %v1805_v15, %v1801_v8  ;;  %v4501_v20 = vadd.f32 %v1849_v54, %v1101_v6 }
 0x269   : > { %v2093_v22 = vpack.c.bf16 %v1807_v21, %v1803_v11  ;;  %v2316_v23 = vpack.c.bf16 %v4499_v4, %v4495_v13 }
 0x26a   : > { %v2539_v25 = vpack.c.bf16 %v4501_v20, %v4497_v17  ;;  %3590 = vmatpush3.bf16.msra.mxu0 %v1857_v19 }
 0x26b   : > { %3622 = vmatpush3.bf16.msra.mxu1 %v2093_v22  ;;  %3595 = vmatprep.subr.bf16.mxu0 %v4085_v2 }
 0x26c   : > { %3627 = vmatprep.subr.bf16.mxu1 %v4085_v2 }
 0x323   : > { %v1892_v36 = vpop.f32.mrb[12].mxu0 }
 0x324   : > { %v1905_v37 = vsel %vm4516_vm8, %v1892_v36, -3.4028235e+38  ;;  %v3587_v38 = vpop.f32.mrb[13].mxu0  ;;  %v2128_v39 = vpop.f32.mrb[12].mxu1 }
 0x325   : > { %v2135_v40 = vsel %vm4516_vm8, %v2128_v39, -3.4028235e+38  ;;  %v1895_v41 = vpop.f32.mrb[14].mxu0  ;;  %v3619_v42 = vpop.f32.mrb[13].mxu1  ;;  %v1908_v30 = vsel %vm1907_vm9, %v1905_v37, -inf }
 0x326   : > { %v1906_v5 = vsel %vm4516_vm8, %v1895_v41, -3.4028235e+38  ;;  %v2131_v43 = vpop.f32.mrb[14].mxu1  ;;  %1909 = vmax.xlane.f32.xlu0 %v1908_v30  ;;  %v3588_v44 = vpop.f32.mrb[15].mxu0  ;;  %v2137_v45 = vsel %vm1907_vm9, %v2135_v40, -inf }
 0x327   : > { %v2136_v46 = vsel %vm4516_vm8, %v2131_v43, -3.4028235e+38  ;;  %2138 = vmax.xlane.f32.xlu1 %v2137_v45  ;;  %v3620_v47 = vpop.f32.mrb[15].mxu1  ;;  %v1911_v48 = vsel %vm1907_vm9, %v1906_v5, -inf  ;;  %v3952_v44 = vld [vmem:[%s4247_s1 + $0x8] sm:$0xff]   ;;  %v3953_v45 = vld [vmem:[%s4247_s1 + $0x40] sm:$0xff]  }
 0x328   : > { %v2140_v49 = vsel %vm1907_vm9, %v2136_v46, -inf  ;;  %v3954_v47 = vld [vmem:[%s4247_s1 + $0x10] sm:$0xff]  }
 0x32a   : > { %1912 = vmax.xlane.f32.xlu0 %v1911_v48  ;;  %v3955_v48 = vld [vmem:[%s4247_s1 + $0x48] sm:$0xff]  }
 0x32b   : > { %2141 = vmax.xlane.f32.xlu1 %v2140_v49  ;;  %v3956_v49 = vld [vmem:[%s4247_s1 + $0x18] sm:$0xff]  }
 0x3b3   : > { %v1910_v50 = vpop.xlane.xlu0 %1909 }
 0x3b4   : > { %v1914_v51 = vsub.f32 %v1905_v37, %v1910_v50  ;;  %v2139_v52 = vpop.xlane.xlu1 %2138  ;;  %v3957_v50 = vld [vmem:[%s4247_s1 + $0x50] sm:$0xff]  }
 0x3b5   : > { %v2143_v55 = vsub.f32 %v2135_v40, %v2139_v52  ;;  %v3951_v40 = vld [vmem:[%s4247_s1] sm:$0xff]   ;;  %v3959_v52 = vld [vmem:[%s4247_s1 + $0x58] sm:$0xff]  }
 0x3b6   : > { %v1916_v57 = vmul.f32 1.442695, %v1914_v51  ;;  %v3958_v51 = vld [vmem:[%s4247_s1 + $0x20] sm:$0xff]  }
 0x3b7   : > { %v2145_v59 = vmul.f32 1.442695, %v2143_v55  ;;  %v1913_v63 = vpop.xlane.xlu0 %1912  ;;  %v3960_v55 = vld [vmem:[%s4247_s1 + $0x28] sm:$0xff]  }
 0x3b8   : > { %3999 = vpow2.f32 %v1916_v57  ;;  %v1915_v0 = vsub.f32 %v1906_v5, %v1913_v63  ;;  %v2142_v1 = vpop.xlane.xlu1 %2141  ;;  %v3961_v57 = vld [vmem:[%s4247_s1 + $0x60] sm:$0xff]   ;;  %v3963_v63 = vld [vmem:[%s4247_s1 + $0x68] sm:$0xff]  }
 0x3b9   : > { %v2144_v3 = vsub.f32 %v2136_v46, %v2142_v1  ;;  %4001 = vpow2.f32 %v2145_v59  ;;  %v3962_v59 = vld [vmem:[%s4247_s1 + $0x30] sm:$0xff]  }
 0x3ba   : > { %v1918_v6 = vmul.f32 1.442695, %v1915_v0  ;;  %v3964_v0 = vld [vmem:[%s4247_s1 + $0x38] sm:$0xff]   ;;  %v3965_v1 = vld [vmem:[%s4247_s1 + $0x70] sm:$0xff]  }
 0x3bb   : > { %v2147_v7 = vmul.f32 1.442695, %v2144_v3  ;;  %v3966_v3 = vld [vmem:[%s4247_s1 + $0x78] sm:$0xff]  }
 0x3bc   : > { %4003 = vpow2.f32 %v1918_v6 }
 0x3bd   : > { %4005 = vpow2.f32 %v2147_v7 }
 0x3c2   : > { %v4000_v8 = vpop.eup %3999 }
 0x3c3   : > { %v1920_v9 = vsel %vm1907_vm9, %v4000_v8, 0.0  ;;  %v4002_v10 = vpop.eup %4001 }
 0x3c4   : > { %1921 = vadd.xlane.f32.xlu0 %v1920_v9  ;;  %v2149_v12 = vsel %vm1907_vm9, %v4002_v10, 0.0 }
 0x3c6   : > { %v4004_v11 = vpop.eup %4003 }
 0x3c7   : > { %v1923_v14 = vsel %vm1907_vm9, %v4004_v11, 0.0  ;;  %v4006_v15 = vpop.eup %4005 }
 0x3c8   : > { %2150 = vadd.xlane.f32.xlu0 %v2149_v12  ;;  %1924 = vadd.xlane.f32.xlu1 %v1923_v14  ;;  %v2152_v16 = vsel %vm1907_vm9, %v4006_v15, 0.0 }
 0x3cc   : > { %2153 = vadd.xlane.f32.xlu1 %v2152_v16 }
 0x451   : > { %v1922_v18 = vpop.xlane.xlu0 %1921 }
 0x452   : > { %4007 = vrcp.f32 %v1922_v18 }
 0x455   : > { %v1925_v21 = vpop.xlane.xlu1 %1924  ;;  %v2151_v54 = vpop.xlane.xlu0 %2150 }
 0x456   : > { %4009 = vrcp.f32 %v1925_v21 }
 0x457   : > { %4011 = vrcp.f32 %v2151_v54 }
 0x459   : > { %v2154_v19 = vpop.xlane.xlu1 %2153 }
 0x45a   : > { %4013 = vrcp.f32 %v2154_v19 }
 0x45c   : > { %v4008_v22 = vpop.eup %4007 }
 0x45d   : > { %v1928_v27 = vmul.f32 %v4008_v22, %v4000_v8 }
 0x45f   : > { %v1930_v38 = vsel %vm4516_vm8, %v1928_v27, 0.0 }
 0x460   : > { %v4010_v29 = vpop.eup %4009 }
 0x461   : > { %v4012_v32 = vpop.eup %4011  ;;  %v1929_v36 = vmul.f32 %v4010_v29, %v4004_v11 }
 0x462   : > { %v2157_v37 = vmul.f32 %v4012_v32, %v4002_v10 }
 0x463   : > { %v1931_v39 = vsel %vm4516_vm8, %v1929_v36, 0.0 }
 0x464   : > { %v4014_v41 = vpop.eup %4013  ;;  %v1932_v42 = vpack.c.bf16 %v1931_v39, %v1930_v38  ;;  %v2159_v5 = vsel %vm4516_vm8, %v2157_v37, 0.0 }
 0x465   : > { %v2158_v30 = vmul.f32 %v4014_v41, %v4006_v15 }
 0x466   : > { %3592 = vmatmul.mubr.msk.bf16.vlgmr.msra.gmra.mrb[16].mxu0 %vm1907_vm9, %v1932_v42 }
 0x467   : > { %v2160_v43 = vsel %vm4516_vm8, %v2158_v30, 0.0  ;;  %3596 = vmatpush3.bf16.msra.mxu0 %v3951_v40  ;;  %3611 = vmatprep.mubr.msk.bf16.mxu0 %vm4086_vm6, %v4085_v2 }
 0x468   : > { %v2161_v46 = vpack.c.bf16 %v2160_v43, %v2159_v5  ;;  %3597 = vmatprep.subr.bf16.mxu0 %v4085_v2 }
 0x46a   : > { %3624 = vmatmul.mubr.msk.bf16.vlgmr.msra.gmra.mrb[16].mxu1 %vm1907_vm9, %v2161_v46 }
 0x46b   : > { %3598 = vmatpush3.bf16.msra.mxu0 %v3952_v44  ;;  %3628 = vmatpush3.bf16.msra.mxu1 %v3953_v45 }
 0x46c   : > { %3599 = vmatprep.subr.bf16.mxu0 %v4085_v2  ;;  %3629 = vmatprep.subr.bf16.mxu1 %v4085_v2 }
 0x46d   : > { %3643 = vmatprep.mubr.msk.bf16.mxu1 %vm4086_vm6, %v4085_v2 }
 0x46f   : > { %3600 = vmatpush3.bf16.msra.mxu0 %v3954_v47  ;;  %3630 = vmatpush3.bf16.msra.mxu1 %v3955_v48 }
 0x470   : > { %3601 = vmatprep.subr.bf16.mxu0 %v4085_v2  ;;  %3631 = vmatprep.subr.bf16.mxu1 %v4085_v2 }
 0x473   : > { %3602 = vmatpush3.bf16.msra.mxu0 %v3956_v49  ;;  %3632 = vmatpush3.bf16.msra.mxu1 %v3957_v50 }
 0x474   : > { %3603 = vmatprep.subr.bf16.mxu0 %v4085_v2  ;;  %3633 = vmatprep.subr.bf16.mxu1 %v4085_v2 }
 0x477   : > { %3604 = vmatpush3.bf16.msra.mxu0 %v3958_v51  ;;  %3634 = vmatpush3.bf16.msra.mxu1 %v3959_v52 }
 0x478   : > { %3605 = vmatprep.subr.bf16.mxu0 %v4085_v2  ;;  %3635 = vmatprep.subr.bf16.mxu1 %v4085_v2 }
 0x47b   : > { %3606 = vmatpush3.bf16.msra.mxu0 %v3960_v55  ;;  %3636 = vmatpush3.bf16.msra.mxu1 %v3961_v57 }
 0x47c   : > { %3607 = vmatprep.subr.bf16.mxu0 %v4085_v2  ;;  %3637 = vmatprep.subr.bf16.mxu1 %v4085_v2 }
 0x47f   : > { %3608 = vmatpush3.bf16.msra.mxu0 %v3962_v59  ;;  %3638 = vmatpush3.bf16.msra.mxu1 %v3963_v63 }
 0x480   : > { %3609 = vmatprep.subr.bf16.mxu0 %v4085_v2  ;;  %3639 = vmatprep.subr.bf16.mxu1 %v4085_v2 }
 0x483   : > { %3610 = vmatpush3.bf16.msra.mxu0 %v3964_v0  ;;  %3640 = vmatpush3.bf16.msra.mxu1 %v3965_v1 }
 0x484   : > { %3641 = vmatprep.subr.bf16.mxu1 %v4085_v2  ;;  %3647 = vmatprep.subr.bf16.mxu0 %v4085_v2 }
 0x487   : > { %3642 = vmatpush3.bf16.msra.mxu1 %v3966_v3 }
 0x488   : > { %3679 = vmatprep.subr.bf16.mxu1 %v4085_v2 }
 0x539   : > { %v1970_v6 = vpop.f32.mrb[16].mxu0 }
 0x53a   : > { %v3593_v7 = vpop.f32.mrb[17].mxu0 }
 0x53b   : > { %v1973_v8 = vpop.f32.mrb[18].mxu0 }
 0x53c   : > { %v1977_v9 = vpack.c.bf16 %v1973_v8, %v1970_v6  ;;  %v3594_v10 = vpop.f32.mrb[19].mxu0 }
 0x53d   : > { %v2199_v11 = vpop.f32.mrb[16].mxu1 }
 0x53e   : > { %3612 = vmatmul.mubr.bf16.vlgmr.msra.gmra.mrb[20].mxu0 %v1977_v9  ;;  %v3625_v12 = vpop.f32.mrb[17].mxu1 }
 0x53f   : > { %3648 = vmatpush3.bf16.xpose.msra.mxu0 %v2315_v61  ;;  %v2202_v14 = vpop.f32.mrb[18].mxu1  ;;  %3649 = vmatprep.mubr.msk.bf16.mxu0 %vm4086_vm6, %v4085_v2 }
 0x540   : > { %v2206_v15 = vpack.c.bf16 %v2202_v14, %v2199_v11  ;;  %v3626_v16 = vpop.f32.mrb[19].mxu1  ;;  %3653 = vmatprep.subr.bf16.mxu0 %v4085_v2 }
 0x541   : > { %v3967_v16 = vld [vmem:[%s4247_s1 + $0x80] sm:$0xff]  }
 0x542   : > { %3644 = vmatmul.mubr.bf16.vlgmr.msra.gmra.mrb[20].mxu1 %v2206_v15 }
 0x543   : > { %3680 = vmatpush3.bf16.xpose.msra.mxu1 %v2538_v62  ;;  %3681 = vmatprep.mubr.msk.bf16.mxu1 %vm4086_vm6, %v4085_v2 }
 0x544   : > { %3685 = vmatprep.subr.bf16.mxu1 %v4085_v2 }
 0x546   : > { %3650 = vmatmul.mubr.bf16.vlgmr.msra.gmra.mrb[24].mxu0 %v2314_v33 }
 0x547   : > { %3654 = vmatpush3.bf16.msra.mxu0 %v2316_v23  ;;  %3655 = vmatprep.mubr.msk.bf16.mxu0 %vm4086_vm6, %v4085_v2 }
 0x548   : > { %3659 = vmatprep.subr.bf16.mxu0 %v4085_v2 }
 0x54a   : > { %3682 = vmatmul.mubr.bf16.vlgmr.msra.gmra.mrb[24].mxu1 %v2537_v35 }
 0x54b   : > { %3686 = vmatpush3.bf16.msra.mxu1 %v2539_v25  ;;  %3687 = vmatprep.mubr.msk.bf16.mxu1 %vm4086_vm6, %v4085_v2 }
 0x54c   : > { %3691 = vmatprep.subr.bf16.mxu1 %v4085_v2 }
 0x611   : > { %v2076_v28 = vpop.f32.mrb[20].mxu0 }
 0x612   : > { %v3613_v33 = vpop.f32.mrb[21].mxu0  ;;  %v2089_v56 = vadd.f32 %v3431_v24, %v2076_v28 }
 0x613   : > { %v2079_v53 = vpop.f32.mrb[22].mxu0 }
 0x614   : > { %v3614_v26 = vpop.f32.mrb[23].mxu0  ;;  %v2090_v35 = vadd.f32 %v3431_v24, %v2079_v53 }
 0x615   : > { %v2305_v31 = vpop.f32.mrb[20].mxu1  ;;  %v3968_v26 = vld [vmem:[%s4247_s1 + $0x88] sm:$0xff]  }
 0x616   : > { %v4617_v58 = vadd.f32 %v2305_v31, %v2089_v56  ;;  %v3645_v60 = vpop.f32.mrb[21].mxu1  ;;  %v3969_v31 = vld [vmem:[%s4247_s1 + $0xc0] sm:$0xff]  }
 0x617   : > { %v2308_v61 = vpop.f32.mrb[22].mxu1  ;;  %v3970_v60 = vld [vmem:[%s4247_s1 + $0x90] sm:$0xff]  }
 0x618   : > { %v4619_v62 = vadd.f32 %v2308_v61, %v2090_v35  ;;  %v3646_v13 = vpop.f32.mrb[23].mxu1  ;;  %v3972_v61 = vld [vmem:[%s4247_s1 + $0x98] sm:$0xff]  }
 0x619   : > { %v2351_v17 = vpop.f32.mrb[24].mxu0  ;;  %v3973_v13 = vld [vmem:[%s4247_s1 + $0xd0] sm:$0xff]  }
 0x61a   : > { %v2358_v4 = vsel %vm4516_vm8, %v2351_v17, -3.4028235e+38  ;;  %v3651_v20 = vpop.f32.mrb[25].mxu0  ;;  %v3974_v17 = vld [vmem:[%s4247_s1 + $0xa0] sm:$0xff]  }
 0x61b   : > { %v2354_v23 = vpop.f32.mrb[26].mxu0  ;;  %v2360_v25 = vsel %vm1907_vm9, %v2358_v4, -inf  ;;  %v3976_v20 = vld [vmem:[%s4247_s1 + $0xa8] sm:$0xff]  }
 0x61c   : > { %v2359_v18 = vsel %vm4516_vm8, %v2354_v23, -3.4028235e+38  ;;  %2361 = vmax.xlane.f32.xlu0 %v2360_v25  ;;  %v3652_v21 = vpop.f32.mrb[27].mxu0  ;;  %v3977_v23 = vld [vmem:[%s4247_s1 + $0xe0] sm:$0xff]   ;;  %v3978_v25 = vld [vmem:[%s4247_s1 + $0xb0] sm:$0xff]  }
 0x61d   : > { %v2574_v54 = vpop.f32.mrb[24].mxu1  ;;  %v2363_v19 = vsel %vm1907_vm9, %v2359_v18, -inf  ;;  %v3980_v21 = vld [vmem:[%s4247_s1 + $0xb8] sm:$0xff]  }
 0x61e   : > { %v2581_v22 = vsel %vm4516_vm8, %v2574_v54, -3.4028235e+38  ;;  %v3683_v27 = vpop.f32.mrb[25].mxu1  ;;  %2364 = vmax.xlane.f32.xlu1 %v2363_v19  ;;  %v3981_v54 = vld [vmem:[%s4247_s1 + $0xf0] sm:$0xff]   ;;  %v3982_v19 = vld [vmem:[%s4247_s1 + $0xf8] sm:$0xff]  }
 0x61f   : > { %v2577_v29 = vpop.f32.mrb[26].mxu1  ;;  %v2583_v32 = vsel %vm1907_vm9, %v2581_v22, -inf }
 0x620   : > { %v2582_v36 = vsel %vm4516_vm8, %v2577_v29, -3.4028235e+38  ;;  %v3684_v37 = vpop.f32.mrb[27].mxu1  ;;  %2584 = vmax.xlane.f32.xlu0 %v2583_v32 }
 0x621   : > { %v2586_v38 = vsel %vm1907_vm9, %v2582_v36, -inf }
 0x622   : > { %2587 = vmax.xlane.f32.xlu1 %v2586_v38 }
 0x6a9   : > { %v2362_v39 = vpop.xlane.xlu0 %2361 }
 0x6aa   : > { %v2366_v40 = vsub.f32 %v2358_v4, %v2362_v39  ;;  %v3975_v4 = vld [vmem:[%s4247_s1 + $0xd8] sm:$0xff]  }
 0x6ab   : > { %v2365_v41 = vpop.xlane.xlu1 %2364 }
 0x6ac   : > { %v2368_v42 = vmul.f32 1.442695, %v2366_v40  ;;  %v2367_v30 = vsub.f32 %v2359_v18, %v2365_v41  ;;  %v3979_v18 = vld [vmem:[%s4247_s1 + $0xe8] sm:$0xff]  }
 0x6ad   : > { %v2585_v5 = vpop.xlane.xlu0 %2584 }
 0x6ae   : > { %4015 = vpow2.f32 %v2368_v42  ;;  %v2370_v43 = vmul.f32 1.442695, %v2367_v30  ;;  %v2589_v44 = vsub.f32 %v2581_v22, %v2585_v5 }
 0x6af   : > { %v2588_v45 = vpop.xlane.xlu1 %2587 }
 0x6b0   : > { %4017 = vpow2.f32 %v2370_v43  ;;  %v2591_v46 = vmul.f32 1.442695, %v2589_v44  ;;  %v2590_v47 = vsub.f32 %v2582_v36, %v2588_v45 }
 0x6b2   : > { %4019 = vpow2.f32 %v2591_v46  ;;  %v2593_v48 = vmul.f32 1.442695, %v2590_v47 }
 0x6b4   : > { %4021 = vpow2.f32 %v2593_v48 }
 0x6b8   : > { %v4016_v49 = vpop.eup %4015 }
 0x6b9   : > { %v2372_v50 = vsel %vm1907_vm9, %v4016_v49, 0.0 }
 0x6ba   : > { %v4018_v51 = vpop.eup %4017  ;;  %2373 = vadd.xlane.f32.xlu0 %v2372_v50  ;;  %v4039_v50 = vld [vmem:[#allocation2] sm:$0xff] }
 0x6bb   : > { %v2375_v52 = vsel %vm1907_vm9, %v4018_v51, 0.0 }
 0x6bc   : > { %v4020_v55 = vpop.eup %4019  ;;  %2376 = vadd.xlane.f32.xlu1 %v2375_v52 }
 0x6bd   : > { %v2595_v57 = vsel %vm1907_vm9, %v4020_v55, 0.0 }
 0x6be   : > { %v4022_v59 = vpop.eup %4021  ;;  %2596 = vadd.xlane.f32.xlu0 %v2595_v57  ;;  %v4040_v57 = vld [vmem:[#allocation2 + $0x8] sm:$0xff] }
 0x6bf   : > { %v2598_v63 = vsel %vm1907_vm9, %v4022_v59, 0.0 }
 0x6c0   : > { %2599 = vadd.xlane.f32.xlu1 %v2598_v63  ;;  %v3983_v63 = vld [vmem:[%s4274_s24] sm:$0xff]  }
 0x747   : > { %v2374_v0 = vpop.xlane.xlu0 %2373 }
 0x748   : > { %4023 = vrcp.f32 %v2374_v0  ;;  %v3984_v0 = vld [vmem:[%s4274_s24 + $0x8] sm:$0xff]  }
 0x749   : > { %v2377_v1 = vpop.xlane.xlu1 %2376 }
 0x74a   : > { %4025 = vrcp.f32 %v2377_v1  ;;  %v3985_v1 = vld [vmem:[%s4274_s24 + $0x10] sm:$0xff]  }
 0x74b   : > { %v2597_v3 = vpop.xlane.xlu0 %2596 }
 0x74c   : > { %4027 = vrcp.f32 %v2597_v3  ;;  %v3986_v3 = vld [vmem:[%s4274_s24 + $0x18] sm:$0xff]  }
 0x74d   : > { %v2600_v6 = vpop.xlane.xlu1 %2599 }
 0x74e   : > { %4029 = vrcp.f32 %v2600_v6  ;;  %v3987_v6 = vld [vmem:[%s4274_s24 + $0x20] sm:$0xff]  }
 0x752   : > { %v4024_v7 = vpop.eup %4023 }
 0x753   : > { %v2380_v8 = vmul.f32 %v4024_v7, %v4016_v49  ;;  %v3988_v7 = vld [vmem:[%s4274_s24 + $0x28] sm:$0xff]  }
 0x754   : > { %v4026_v9 = vpop.eup %4025 }
 0x755   : > { %v2381_v10 = vmul.f32 %v4026_v9, %v4018_v51  ;;  %v2382_v14 = vsel %vm4516_vm8, %v2380_v8, 0.0  ;;  %v3989_v8 = vld [vmem:[%s4274_s24 + $0x30] sm:$0xff]   ;;  %v3990_v9 = vld [vmem:[%s4274_s24 + $0x38] sm:$0xff]  }
 0x756   : > { %v4028_v11 = vpop.eup %4027 }
 0x757   : > { %v2603_v12 = vmul.f32 %v4028_v11, %v4020_v55  ;;  %v2383_v15 = vsel %vm4516_vm8, %v2381_v10, 0.0  ;;  %v3991_v10 = vld [vmem:[%s4279_s5] sm:$0xff]   ;;  %v3992_v11 = vld [vmem:[%s4279_s5 + $0x8] sm:$0xff]  }
 0x758   : > { %v4030_v24 = vpop.eup %4029  ;;  %v2384_v28 = vpack.c.bf16 %v2383_v15, %v2382_v14  ;;  %v3994_v14 = vld [vmem:[%s4279_s5 + $0x18] sm:$0xff]   ;;  %v3995_v15 = vld [vmem:[%s4279_s5 + $0x20] sm:$0xff]  }
 0x759   : > { %v2604_v33 = vmul.f32 %v4030_v24, %v4022_v59  ;;  %v2605_v53 = vsel %vm4516_vm8, %v2603_v12, 0.0  ;;  %v3993_v12 = vld [vmem:[%s4279_s5 + $0x10] sm:$0xff]  }
 0x75a   : > { %3656 = vmatmul.mubr.msk.bf16.vlgmr.msra.gmra.mrb[28].mxu0 %vm1907_vm9, %v2384_v28 }
 0x75b   : > { %v2606_v56 = vsel %vm4516_vm8, %v2604_v33, 0.0  ;;  %3660 = vmatpush3.bf16.msra.mxu0 %v3967_v16  ;;  %3675 = vmatprep.mubr.msk.bf16.mxu0 %vm4086_vm6, %v4085_v2  ;;  %v3996_v16 = vld [vmem:[%s4279_s5 + $0x28] sm:$0xff]  }
 0x75c   : > { %v2607_v35 = vpack.c.bf16 %v2606_v56, %v2605_v53  ;;  %3661 = vmatprep.subr.bf16.mxu0 %v4085_v2 }
 0x75e   : > { %3688 = vmatmul.mubr.msk.bf16.vlgmr.msra.gmra.mrb[28].mxu1 %vm1907_vm9, %v2607_v35 }
 0x75f   : > { %3662 = vmatpush3.bf16.msra.mxu0 %v3968_v26  ;;  %3692 = vmatpush3.bf16.msra.mxu1 %v3969_v31 }
 0x760   : > { %3663 = vmatprep.subr.bf16.mxu0 %v4085_v2  ;;  %3693 = vmatprep.subr.bf16.mxu1 %v4085_v2 }
 0x761   : > { %3707 = vmatprep.mubr.msk.bf16.mxu1 %vm4086_vm6, %v4085_v2 }
 0x763   : > { %3664 = vmatpush3.bf16.msra.mxu0 %v3970_v60  ;;  %3694 = vmatpush3.bf16.msra.mxu1 %v3971_v34 }
 0x764   : > { %3665 = vmatprep.subr.bf16.mxu0 %v4085_v2  ;;  %3695 = vmatprep.subr.bf16.mxu1 %v4085_v2 }
 0x767   : > { %3666 = vmatpush3.bf16.msra.mxu0 %v3972_v61  ;;  %3696 = vmatpush3.bf16.msra.mxu1 %v3973_v13 }
 0x768   : > { %3667 = vmatprep.subr.bf16.mxu0 %v4085_v2  ;;  %3697 = vmatprep.subr.bf16.mxu1 %v4085_v2 }
 0x76b   : > { %3668 = vmatpush3.bf16.msra.mxu0 %v3974_v17  ;;  %3698 = vmatpush3.bf16.msra.mxu1 %v3975_v4 }
 0x76c   : > { %3669 = vmatprep.subr.bf16.mxu0 %v4085_v2  ;;  %3699 = vmatprep.subr.bf16.mxu1 %v4085_v2 }
 0x76f   : > { %3670 = vmatpush3.bf16.msra.mxu0 %v3976_v20  ;;  %3700 = vmatpush3.bf16.msra.mxu1 %v3977_v23 }
 0x770   : > { %3671 = vmatprep.subr.bf16.mxu0 %v4085_v2  ;;  %3701 = vmatprep.subr.bf16.mxu1 %v4085_v2 }
 0x773   : > { %3672 = vmatpush3.bf16.msra.mxu0 %v3978_v25  ;;  %3702 = vmatpush3.bf16.msra.mxu1 %v3979_v18  ;;  %v3459_v25 = vld [vmem:[%s4849_s30] ss:$0 sm:$0xff] }
 0x774   : > { %3673 = vmatprep.subr.bf16.mxu0 %v4085_v2  ;;  %3703 = vmatprep.subr.bf16.mxu1 %v4085_v2 }
 0x777   : > { %3674 = vmatpush3.bf16.msra.mxu0 %v3980_v21  ;;  %3704 = vmatpush3.bf16.msra.mxu1 %v3981_v54 }
 0x778   : > { %3705 = vmatprep.subr.bf16.mxu1 %v4085_v2  ;;  %3711 = vmatprep.subr.bf16.mxu0 %v4085_v2 }
 0x77b   : > { %3706 = vmatpush3.bf16.msra.mxu1 %v3982_v19 }
 0x77c   : > { %3731 = vmatprep.subr.bf16.mxu1 %v4085_v2 }
 0x82d   : > { %v2422_v22 = vpop.f32.mrb[28].mxu0 }
 0x82e   : > { %v3657_v27 = vpop.f32.mrb[29].mxu0 }
 0x82f   : > { %v2425_v29 = vpop.f32.mrb[30].mxu0  ;;  %v3460_v27 = vld [vmem:[%s4851_s0] ss:$0 sm:$0xff] }
 0x830   : > { %v2429_v32 = vpack.c.bf16 %v2425_v29, %v2422_v22  ;;  %v3658_v36 = vpop.f32.mrb[31].mxu0 }
 0x831   : > { %v2645_v37 = vpop.f32.mrb[28].mxu1 }
 0x832   : > { %3676 = vmatmul.mubr.bf16.vlgmr.msra.gmra.mrb[32].mxu0 %v2429_v32  ;;  %v3689_v38 = vpop.f32.mrb[29].mxu1 }
 0x833   : > { %v2648_v39 = vpop.f32.mrb[30].mxu1  ;;  %3727 = vmatprep.mubr.msk.bf16.mxu0 %vm4086_vm6, %v4085_v2  ;;  %3712 = vmatpush3.bf16.msra.mxu0 %v3983_v63  ;;  %v3997_v38 = vld [vmem:[%s4279_s5 + $0x30] sm:$0xff]  }
 0x834   : > { %v2652_v40 = vpack.c.bf16 %v2648_v39, %v2645_v37  ;;  %v3690_v41 = vpop.f32.mrb[31].mxu1  ;;  %3713 = vmatprep.subr.bf16.mxu0 %v4085_v2  ;;  %v3998_v39 = vld [vmem:[%s4279_s5 + $0x38] sm:$0xff]  }
 0x836   : > { %3708 = vmatmul.mubr.bf16.vlgmr.msra.gmra.mrb[32].mxu1 %v2652_v40  ;;  %v3461_v40 = vld [vmem:[%s4853_s8] ss:$0 sm:$0xff] }
 0x837   : > { %3747 = vmatprep.mubr.msk.bf16.mxu1 %vm4086_vm6, %v4085_v2  ;;  %3714 = vmatpush3.bf16.msra.mxu0 %v3984_v0 }
 0x838   : > { %3715 = vmatprep.subr.bf16.mxu0 %v4085_v2  ;;  %3732 = vmatpush3.bf16.msra.mxu1 %v3991_v10 }
 0x839   : > { %3733 = vmatprep.subr.bf16.mxu1 %v4085_v2 }
 0x83b   : > { %3716 = vmatpush3.bf16.msra.mxu0 %v3985_v1 }
 0x83c   : > { %3717 = vmatprep.subr.bf16.mxu0 %v4085_v2  ;;  %3734 = vmatpush3.bf16.msra.mxu1 %v3992_v11 }
 0x83d   : > { %3735 = vmatprep.subr.bf16.mxu1 %v4085_v2 }
 0x83f   : > { %3718 = vmatpush3.bf16.msra.mxu0 %v3986_v3 }
 0x840   : > { %3719 = vmatprep.subr.bf16.mxu0 %v4085_v2  ;;  %3736 = vmatpush3.bf16.msra.mxu1 %v3993_v12 }
 0x841   : > { %3737 = vmatprep.subr.bf16.mxu1 %v4085_v2 }
 0x843   : > { %3720 = vmatpush3.bf16.msra.mxu0 %v3987_v6 }
 0x844   : > { %3721 = vmatprep.subr.bf16.mxu0 %v4085_v2  ;;  %3738 = vmatpush3.bf16.msra.mxu1 %v3994_v14 }
 0x845   : > { %3739 = vmatprep.subr.bf16.mxu1 %v4085_v2 }
 0x847   : > { %3722 = vmatpush3.bf16.msra.mxu0 %v3988_v7 }
 0x848   : > { %3723 = vmatprep.subr.bf16.mxu0 %v4085_v2  ;;  %3740 = vmatpush3.bf16.msra.mxu1 %v3995_v15 }
 0x849   : > { %3741 = vmatprep.subr.bf16.mxu1 %v4085_v2 }
 0x84b   : > { %3724 = vmatpush3.bf16.msra.mxu0 %v3989_v8 }
 0x84c   : > { %3725 = vmatprep.subr.bf16.mxu0 %v4085_v2  ;;  %3742 = vmatpush3.bf16.msra.mxu1 %v3996_v16 }
 0x84d   : > { %3743 = vmatprep.subr.bf16.mxu1 %v4085_v2 }
 0x84f   : > { %3726 = vmatpush3.bf16.msra.mxu0 %v3990_v9 }
 0x850   : > { %3744 = vmatpush3.bf16.msra.mxu1 %v3997_v38 }
 0x851   : > { %3745 = vmatprep.subr.bf16.mxu1 %v4085_v2  ;;  %v3470_v2 = vld [vmem:[%s805_s4] ss:$0 sm:$0xff] }
 0x854   : > { %3746 = vmatpush3.bf16.msra.mxu1 %v3998_v39 }
 0x905   : > { %v2528_v42 = vpop.f32.mrb[32].mxu0 }
 0x906   : > { %v2535_v30 = vadd.f32 %v2528_v42, %v4617_v58  ;;  %v3677_v5 = vpop.f32.mrb[33].mxu0 }
 0x907   : > { %v2531_v43 = vpop.f32.mrb[34].mxu0 }
 0x908   : > { %v2536_v44 = vadd.f32 %v2531_v43, %v4619_v62  ;;  %v3678_v45 = vpop.f32.mrb[35].mxu0 }
 0x909   : > { %v2751_v46 = vpop.f32.mrb[32].mxu1 }
 0x90a   : > { %v2758_v47 = vadd.f32 %v2751_v46, %v2535_v30  ;;  %v3709_v48 = vpop.f32.mrb[33].mxu1 }
 0x90b   : > { %v2754_v49 = vpop.f32.mrb[34].mxu1 }
 0x90c   : > { %v4689_v51 = vadd.f32 %v4039_v50, %v2758_v47  ;;  %v2759_v52 = vadd.f32 %v2754_v49, %v2536_v44  ;;  %v3710_v55 = vpop.f32.mrb[35].mxu1 }
 0x90e   : > { %v4691_v59 = vadd.f32 %v4040_v57, %v2759_v52  ;;  %2764 = vadd.xlane.f32.xlu0 %v4689_v51  ;;  %v2770_v58 = vmul.f32 %v4689_v51, %v4689_v51 }
 0x910   : > { %2766 = vadd.xlane.f32.xlu1 %v4691_v59  ;;  %v2771_v62 = vmul.f32 %v4691_v59, %v4691_v59 }
 0x912   : > { %2772 = vadd.xlane.f32.xlu0 %v2770_v58 }
 0x914   : > { %2774 = vadd.xlane.f32.xlu1 %v2771_v62 }
 0x99b   : > { %v2765_v24 = vpop.xlane.xlu0 %2764 }
 0x99c   : > { %v2768_v28 = vmul.f32 0.03125, %v2765_v24 }
 0x99d   : > { %v2767_v33 = vpop.xlane.xlu1 %2766 }
 0x99e   : > { %v2769_v53 = vmul.f32 0.03125, %v2767_v33  ;;  %v2778_v26 = vmul.f32 %v2768_v28, %v2768_v28  ;;  %v2782_v20 = vsub.f32 %v4689_v51, %v2768_v28  ;;  %v3479_v33 = vld [vmem:[%s808_s7] ss:$0 sm:$0xff] }
 0x99f   : > { %v2773_v56 = vpop.xlane.xlu0 %2772 }
 0x9a0   : > { %v2776_v31 = vmul.f32 0.03125, %v2773_v56  ;;  %v2779_v60 = vmul.f32 %v2769_v53, %v2769_v53  ;;  %v2783_v18 = vsub.f32 %v4691_v59, %v2769_v53 }
 0x9a1   : > { %v2775_v35 = vpop.xlane.xlu1 %2774 }
 0x9a2   : > { %v2780_v34 = vsub.f32 %v2776_v31, %v2778_v26  ;;  %v2777_v61 = vmul.f32 0.03125, %v2775_v35  ;;  %v3480_v31 = vld [vmem:[%s811_s13] ss:$0 sm:$0xff] }
 0x9a4   : > { %v2784_v13 = vadd.f32 1e-05, %v2780_v34  ;;  %v2781_v17 = vsub.f32 %v2777_v61, %v2779_v60 }
 0x9a6   : > { %4031 = vrsqrt.f32 %v2784_v13  ;;  %v2785_v4 = vadd.f32 1e-05, %v2781_v17 }
 0x9a8   : > { %4033 = vrsqrt.f32 %v2785_v4 }
 0x9b0   : > { %v4032_v23 = vpop.eup %4031 }
 0x9b1   : > { %v2788_v21 = vmul.f32 %v4032_v23, %v2782_v20 }
 0x9b2   : > { %v4034_v54 = vpop.eup %4033 }
 0x9b3   : > { %v2789_v19 = vmul.f32 %v4034_v54, %v2783_v18  ;;  %v2796_v22 = vmul.f32 %v3459_v25, %v2788_v21 }
 0x9b5   : > { %v2797_v29 = vmul.f32 %v3459_v25, %v2789_v19  ;;  %v2804_v32 = vadd.f32 %v3460_v27, %v2796_v22 }
 0x9b7   : > { %v2805_v36 = vadd.f32 %v3460_v27, %v2797_v29 }
 0x9b9   : > { %v2806_v37 = vpack.c.bf16 %v2805_v36, %v2804_v32 }
 0x9bb   : > { %3728 = vmatmul.mubr.bf16.vlgmr.msra.gmra.mrb[36].mxu0 %v2806_v37 }
 0xa8e   : > { %v2912_v41 = vpop.f32.mrb[36].mxu0 }
 0xa8f   : > { %v2913_v42 = vadd.f32 %v3461_v40, %v2912_v41  ;;  %v3729_v30 = vpop.f32.mrb[37].mxu0 }
 0xa90   : > { %v2915_v5 = vpop.f32.mrb[38].mxu0 }
 0xa91   : > { %v2916_v43 = vadd.f32 %v3461_v40, %v2915_v5  ;;  %v3730_v44 = vpop.f32.mrb[39].mxu0  ;;  %v2919_v45 = vmax.f32 %v2913_v42, 0.0 }
 0xa93   : > { %v2920_v46 = vmax.f32 %v2916_v43, 0.0 }
 0xa95   : > { %v2921_v47 = vpack.c.bf16 %v2920_v46, %v2919_v45 }
 0xa97   : > { %3748 = vmatmul.mubr.bf16.vlgmr.msra.gmra.mrb[36].mxu1 %v2921_v47 }
 0xb6a   : > { %v3027_v48 = vpop.f32.mrb[36].mxu1 }
 0xb6b   : > { %v3028_v49 = vadd.f32 %v3470_v2, %v3027_v48  ;;  %v3749_v50 = vpop.f32.mrb[37].mxu1 }
 0xb6c   : > { %v3030_v51 = vpop.f32.mrb[38].mxu1 }
 0xb6d   : > { %v3034_v52 = vadd.f32 %v3028_v49, %v2804_v32  ;;  %v3031_v55 = vadd.f32 %v3470_v2, %v3030_v51  ;;  %v3750_v57 = vpop.f32.mrb[39].mxu1 }
 0xb6f   : > { %v3035_v59 = vadd.f32 %v3031_v55, %v2805_v36  ;;  %3038 = vadd.xlane.f32.xlu0 %v3034_v52  ;;  %v3044_v58 = vmul.f32 %v3034_v52, %v3034_v52 }
 0xb71   : > { %3040 = vadd.xlane.f32.xlu1 %v3035_v59  ;;  %v3045_v62 = vmul.f32 %v3035_v59, %v3035_v59 }
 0xb73   : > { %3046 = vadd.xlane.f32.xlu0 %v3044_v58 }
 0xb75   : > { %3048 = vadd.xlane.f32.xlu1 %v3045_v62 }
 0xbfc   : > { %v3039_v63 = vpop.xlane.xlu0 %3038 }
 0xbfd   : > { %v3042_v0 = vmul.f32 0.03125, %v3039_v63 }
 0xbfe   : > { %v3041_v1 = vpop.xlane.xlu1 %3040 }
 0xbff   : > { %v3043_v3 = vmul.f32 0.03125, %v3041_v1  ;;  %v3052_v7 = vmul.f32 %v3042_v0, %v3042_v0  ;;  %v3056_v24 = vsub.f32 %v3034_v52, %v3042_v0 }
 0xc00   : > { %v3047_v6 = vpop.xlane.xlu0 %3046 }
 0xc01   : > { %v3050_v8 = vmul.f32 0.03125, %v3047_v6  ;;  %v3053_v10 = vmul.f32 %v3043_v3, %v3043_v3  ;;  %v3057_v53 = vsub.f32 %v3035_v59, %v3043_v3 }
 0xc02   : > { %v3049_v9 = vpop.xlane.xlu1 %3048 }
 0xc03   : > { %v3054_v11 = vsub.f32 %v3050_v8, %v3052_v7  ;;  %v3051_v12 = vmul.f32 0.03125, %v3049_v9 }
 0xc05   : > { %v3058_v14 = vadd.f32 1e-05, %v3054_v11  ;;  %v3055_v15 = vsub.f32 %v3051_v12, %v3053_v10 }
 0xc07   : > { %4035 = vrsqrt.f32 %v3058_v14  ;;  %v3059_v16 = vadd.f32 1e-05, %v3055_v15 }
 0xc09   : > { %4037 = vrsqrt.f32 %v3059_v16 }
 0xc11   : > { %v4036_v28 = vpop.eup %4035 }
 0xc12   : > { %v3062_v56 = vmul.f32 %v4036_v28, %v3056_v24 }
 0xc13   : > { %v4038_v26 = vpop.eup %4037 }
 0xc14   : > { %v3070_v35 = vmul.f32 %v3479_v33, %v3062_v56  ;;  %v3063_v60 = vmul.f32 %v4038_v26, %v3057_v53  ;;  %3085 = sbr.rel (%p3481_p8) target bundleno = 3099 (0xc1b), region = 100 }
 0xc16   : > { %v3078_v34 = vadd.f32 %v3480_v31, %v3070_v35  ;;  %v3071_v61 = vmul.f32 %v3479_v33, %v3063_v60 }
 0xc18   : > { %3080 = vst [vmem:[#allocation2] sm:$0xff] %v3078_v34  ;;  %v3079_v13 = vadd.f32 %v3480_v31, %v3071_v61  ;;  %3086 = vst [vmem:[%s4296_s11] sm:$0xff] (!%p3481_p8), %v3078_v34 }
 0xc1a   : > { %3081 = vst [vmem:[#allocation2 + $0x8] sm:$0xff] %v3079_v13  ;;  %3087 = vst [vmem:[%s4296_s11 + $0x8] sm:$0xff] (!%p3481_p8), %v3079_v13 }
 0xc1b PF: > { %s4857_s7 = sld [smem:[#allocation6_spill]]  ;;  %s4858_s27 = sld [smem:[#allocation4_spill]] }
 0xc1c   : > { %s4859_s28 = sld [smem:[#allocation5_spill]]  ;;  %s4860_s29 = sld [smem:[#allocation7_spill]] }
 0xc1d   : > { %s4861_s30 = sld [smem:[#allocation8_spill]] }
 0xc21   : > { %s28_s0 = sadd.s32 1, %s4857_s7  }
 0xc22   : > { %p25_p9 = scmp.ge.s32.totalorder %s28_s0, 6  }
 0xc24   :  { %27 = sbr.rel (!%p25_p9) target bundleno = 16 (0x10), region = 172 }

</bundles_post_ra>
